<compile_context>
chip_gen: v6e
topology: v6e:2x2x1
jax: 0.10.0
libtpu: 0.0.40
codegen_flags: <defaults>
</compile_context>

<pallas_src>
import math
import functools

import jax
import jax.numpy as jnp
from jax import lax
from jax.experimental import pallas as pl
from jax.experimental.pallas import tpu as pltpu

EPS = 1e-6  # LayerNorm eps from the reference module


def _layernorm(x, a, b, d):
    # Annotated-Transformer LayerNorm: unbiased std (ddof=1), divide by (std + eps).
    mean = jnp.mean(x, axis=-1, keepdims=True)
    var = jnp.sum((x - mean) ** 2, axis=-1, keepdims=True) * (1.0 / (d - 1))
    inv = 1.0 / (jnp.sqrt(var) + EPS)          # exact division (numerics)
    return a * (x - mean) * inv + b


def encoder_kernel(x_ref, mask_ref,
                   wqkv_ref, bqkv_ref, wo_ref, w1_ref, b1_ref, w2_ref,
                   vecs_ref, fin_ref,
                   o_ref, x_vmem, *, num_heads):
    l = pl.program_id(1)
    n_layers = pl.num_programs(1)

    # Load the activation into the resident f32 carry buffer on the first layer.
    @pl.when(l == 0)
    def _():
        x_vmem[...] = x_ref[...].astype(jnp.float32)

    xb = x_vmem[...]                      # (Bt, S, D) f32, resident across layers
    Bt, S, D = xb.shape
    M = Bt * S
    H = num_heads
    dk = D // H
    scale = 1.0 / math.sqrt(dk)

    x = xb.reshape(M, D)                  # all dense math on (Bt*S, D) rows

    # Packed per-layer (6, D) f32 vectors: ln1_a, ln1_b, ln2_a, ln2_b, bo, b2
    vecs = vecs_ref[0]
    ln1_a, ln1_b = vecs[0:1, :], vecs[1:2, :]
    ln2_a, ln2_b = vecs[2:3, :], vecs[3:4, :]
    bo, b2 = vecs[4:5, :], vecs[5:6, :]

    kmask = mask_ref[...] == 0.0          # (Bt, 1, S) bool; True = masked key

    # ---- sublayer 0: x + SelfAttn(LayerNorm(x))  (dropout = identity) ----
    xn = _layernorm(x, ln1_a, ln1_b, D).astype(jnp.bfloat16)
    qkv = (jnp.dot(xn, wqkv_ref[0], preferred_element_type=jnp.float32)
           + bqkv_ref[0])                 # (M, 3D) f32, single fused QKV GEMM
    qkv = qkv.reshape(Bt, S, 3 * D)
    q = qkv[:, :, 0:D]
    k = qkv[:, :, D:2 * D]
    v = qkv[:, :, 2 * D:3 * D]

    ctx_heads = []
    for h in range(H):                    # static unroll (small H)
        sl = slice(h * dk, (h + 1) * dk)
        qh = q[:, :, sl].astype(jnp.bfloat16)
        kh = k[:, :, sl].astype(jnp.bfloat16)
        vh = v[:, :, sl].astype(jnp.bfloat16)
        s = jnp.einsum('bqd,bkd->bqk', qh, kh,
                       preferred_element_type=jnp.float32) * scale
        s = jnp.where(kmask, -1e9, s)     # broadcast over query rows
        m = jnp.max(s, axis=-1, keepdims=True)
        p = jnp.exp(s - m)
        p = p * pl.reciprocal(jnp.sum(p, axis=-1, keepdims=True), approx=True)
        ctx_heads.append(
            jnp.einsum('bqk,bkd->bqd', p.astype(jnp.bfloat16), vh,
                       preferred_element_type=jnp.float32))
    # Concat heads, then ONE full-K output-projection GEMM (MXU-friendly).
    ctx = jnp.concatenate(ctx_heads, axis=-1).astype(jnp.bfloat16).reshape(M, D)
    attn = jnp.dot(ctx, wo_ref[0], preferred_element_type=jnp.float32) + bo
    x = x + attn

    # ---- sublayer 1: x + FFN(LayerNorm(x))  (dropout = identity) ----
    xn2 = _layernorm(x, ln2_a, ln2_b, D).astype(jnp.bfloat16)
    hid = jnp.maximum(
        jnp.dot(xn2, w1_ref[0], preferred_element_type=jnp.float32) + b1_ref[0],
        0.0).astype(jnp.bfloat16)         # cast ReLU output immediately
    ff = jnp.dot(hid, w2_ref[0], preferred_element_type=jnp.float32) + b2
    x = x + ff

    x_vmem[...] = x.reshape(Bt, S, D)     # carry to the next layer step

    # Final LayerNorm fused into the last layer step; only write output then.
    @pl.when(l == n_layers - 1)
    def _():
        y = _layernorm(x, fin_ref[0:1, :], fin_ref[1:2, :], D)
        o_ref[...] = y.reshape(Bt, S, D).astype(o_ref.dtype)


def encoder_forward(x, mask, params, *, batch_tile=None):
    B, S, D = x.shape
    H = params["num_heads"]
    wqkv, bqkv, wo, w1, b1, w2, vecs = params["stacked"]
    fin = params["final_norm"]            # (2, D): [scale; shift]
    L = wqkv.shape[0]
    d_ff = w1.shape[-1]

    # ---- generation-aware VMEM budget (v5e/v6e: 128 MiB, v7x: 64 MiB) ----
    try:
        vmem_cap = int(pltpu.get_tpu_info().vmem_capacity_bytes)
    except Exception:
        vmem_cap = 64 << 20               # conservative (v7x per-TensorCore)
    vmem_ceiling = (vmem_cap * 3) // 4    # ~25% headroom for internal scratch

    layer_w_bytes = sum(int(w.size // L) * w.dtype.itemsize
                        for w in (wqkv, bqkv, wo, w1, b1, w2, vecs))

    def act_bytes(bt):
        m = bt * S
        return (bt * S * D * 4                       # f32 carry scratch
                + 2 * bt * S * D * x.dtype.itemsize  # x block in + out
                + m * 3 * D * 4                      # fused qkv
                + bt * S * S * 4                     # one head's score tile
                + m * d_ff * 4                       # ffn hidden
                + 2 * m * D * 4)                     # residual temps

    if batch_tile is None:
        budget = max(vmem_ceiling - 4 * layer_w_bytes - (8 << 20), 1 << 20)
        divisors = [bt for bt in range(1, B + 1) if B % bt == 0]
        fits = [bt for bt in divisors if act_bytes(bt) <= budget]
        # keep the parallel grid axis >= 2 when possible (v7x has 2 TCs)
        par = [bt for bt in fits if B // bt >= 2]
        batch_tile = max(par) if par else (max(fits) if fits else 1)
    Bt = batch_tile
    assert B % Bt == 0, "batch_tile must divide batch"

    def wspec(arr):                        # streamed per-layer stacked weights
        n = arr.ndim - 1
        return pl.BlockSpec((1,) + tuple(arr.shape[1:]),
                            lambda b, l, _n=n: (l,) + (0,) * _n)

    xspec = pl.BlockSpec((Bt, S, D), lambda b, l: (b, 0, 0))
    mspec = pl.BlockSpec((Bt, 1, S), lambda b, l: (b, 0, 0))
    finspec = pl.BlockSpec(tuple(fin.shape), lambda b, l: (0, 0))

    in_specs = ([xspec, mspec]
                + [wspec(w) for w in (wqkv, bqkv, wo, w1, b1, w2, vecs)]
                + [finspec])

    per_step = (2 * layer_w_bytes + act_bytes(Bt)
                + fin.size * fin.dtype.itemsize
                + 2 * Bt * S * mask.dtype.itemsize)
    vmem_limit = int(min(max(per_step + (8 << 20), 32 << 20), vmem_ceiling))

    return pl.pallas_call(
        functools.partial(encoder_kernel, num_heads=H),
        out_shape=jax.ShapeDtypeStruct((B, S, D), x.dtype),
        grid_spec=pltpu.PrefetchScalarGridSpec(
            num_scalar_prefetch=0,
            grid=(B // Bt, L),
            in_specs=in_specs,
            out_specs=xspec,
            scratch_shapes=[pltpu.VMEM((Bt, S, D), jnp.float32)]),
        compiler_params=pltpu.CompilerParams(
            dimension_semantics=("parallel", "arbitrary"),
            vmem_limit_bytes=vmem_limit),
    )(x, mask, wqkv, bqkv, wo, w1, b1, w2, vecs, fin)


def init_params(key, n_layers, d_model, d_ff, num_heads):
    # Weights in bf16 (halves weight DMA / VMEM); biases & LN params in f32.
    def wmat(k, fan_in, fan_out):
        return (0.02 * jax.random.normal(
            k, (n_layers, fan_in, fan_out), jnp.float32)).astype(jnp.bfloat16)

    kq, kk, kv, ko, k1, k2 = jax.random.split(key, 6)
    wq = wmat(kq, d_model, d_model)
    wk = wmat(kk, d_model, d_model)
    wv = wmat(kv, d_model, d_model)
    wqkv = jnp.concatenate([wq, wk, wv], axis=-1)               # (L, D, 3D)
    bqkv = jnp.zeros((n_layers, 1, 3 * d_model), jnp.float32)   # (L, 1, 3D)
    wo = wmat(ko, d_model, d_model)
    w1 = wmat(k1, d_model, d_ff)
    b1 = jnp.zeros((n_layers, 1, d_ff), jnp.float32)
    w2 = wmat(k2, d_ff, d_model)

    # Independent pre-attn / pre-FFN LayerNorm parameters (not tied).
    ln1_a = jnp.ones((n_layers, d_model), jnp.float32)
    ln1_b = jnp.zeros((n_layers, d_model), jnp.float32)
    ln2_a = jnp.ones((n_layers, d_model), jnp.float32)
    ln2_b = jnp.zeros((n_layers, d_model), jnp.float32)
    bo = jnp.zeros((n_layers, d_model), jnp.float32)
    b2 = jnp.zeros((n_layers, d_model), jnp.float32)
    # One packed (L, 6, D) array: ln1_a, ln1_b, ln2_a, ln2_b, bo, b2
    vecs = jnp.stack([ln1_a, ln1_b, ln2_a, ln2_b, bo, b2], axis=1)

    fin = jnp.stack([jnp.ones((d_model,), jnp.float32),
                     jnp.zeros((d_model,), jnp.float32)], axis=0)  # (2, D)

    return {"num_heads": num_heads,
            "stacked": (wqkv, bqkv, wo, w1, b1, w2, vecs),
            "final_norm": fin}


if __name__ == "__main__":
    B, S, D, H, D_FF, N_LAYERS = 2, 8, 32, 4, 64, 2
    # NOTE: these demo shapes are far below MXU-friendly sizes (D mult of 128,
    # dk >= 128); they exercise correctness only, not performance.

    key = jax.random.PRNGKey(0)
    kx, kp = jax.random.split(key)
    x = jax.random.normal(kx, (B, S, D), jnp.float32)
    mask = jnp.ones((B, 1, S), jnp.float32)
    mask = mask.at[1, 0, 6:].set(0.0)     # mask out last two positions of batch 1

    params = init_params(kp, N_LAYERS, D, D_FF, H)

    out = encoder_forward(x, mask, params)
    jax.block_until_ready(out)
    assert out.shape == (B, S, D)
    print("KERNEL_OK")
</pallas_src>

<mosaic_0001>
module attributes {stable_mosaic.version = 11 : i64} {
  func.func @encoder_kernel(%arg0: i32, %arg1: i32, %arg2: memref<1x8x32xf32, #tpu.memory_space<vmem>>, %arg3: memref<1x1x8xf32, #tpu.memory_space<vmem>>, %arg4: memref<1x32x96xbf16, #tpu.memory_space<vmem>>, %arg5: memref<1x1x96xf32, #tpu.memory_space<vmem>>, %arg6: memref<1x32x32xbf16, #tpu.memory_space<vmem>>, %arg7: memref<1x32x64xbf16, #tpu.memory_space<vmem>>, %arg8: memref<1x1x64xf32, #tpu.memory_space<vmem>>, %arg9: memref<1x64x32xbf16, #tpu.memory_space<vmem>>, %arg10: memref<1x6x32xf32, #tpu.memory_space<vmem>>, %arg11: memref<2x32xf32, #tpu.memory_space<vmem>>, %arg12: memref<1x8x32xf32, #tpu.memory_space<vmem>>, %arg13: memref<1x8x32xf32, #tpu.memory_space<vmem>>) attributes {dimension_semantics = [#tpu.dimension_semantics<parallel>, #tpu.dimension_semantics<arbitrary>], iteration_bounds = array<i64: 2, 2>, scalar_prefetch = 0 : i64, scratch_operands = 1 : i64, tpu.core_type = #tpu.core_type<tc>, window_params = [{transform_indices = @transform_0, window_bounds = array<i64: 1, 8, 32>}, {transform_indices = @transform_1, window_bounds = array<i64: 1, 1, 8>}, {transform_indices = @transform_2, window_bounds = array<i64: 1, 32, 96>}, {transform_indices = @transform_3, window_bounds = array<i64: 1, 1, 96>}, {transform_indices = @transform_4, window_bounds = array<i64: 1, 32, 32>}, {transform_indices = @transform_5, window_bounds = array<i64: 1, 32, 64>}, {transform_indices = @transform_6, window_bounds = array<i64: 1, 1, 64>}, {transform_indices = @transform_7, window_bounds = array<i64: 1, 64, 32>}, {transform_indices = @transform_8, window_bounds = array<i64: 1, 6, 32>}, {pipeline_mode = #tpu.pipeline_mode<synchronous>, transform_indices = @transform_9, window_bounds = array<i64: 2, 32>}, {transform_indices = @transform_10, window_bounds = array<i64: 1, 8, 32>}]} {
    %c0_i32 = arith.constant 0 : i32
    %0 = arith.cmpi eq, %arg1, %c0_i32 : i32
    %1 = arith.extui %0 : i1 to i32
    %c0_i32_0 = arith.constant 0 : i32
    %2 = arith.cmpi ne, %1, %c0_i32_0 : i32
    scf.if %2 {
      %c0_72 = arith.constant 0 : index
      %c0_73 = arith.constant 0 : index
      %c0_74 = arith.constant 0 : index
      %207 = vector.load %arg2[%c0_72, %c0_73, %c0_74] : memref<1x8x32xf32, #tpu.memory_space<vmem>>, vector<1x8x32xf32>
      %c0_75 = arith.constant 0 : index
      %c0_76 = arith.constant 0 : index
      %c0_77 = arith.constant 0 : index
      %208 = vector.load %arg13[%c0_75, %c0_76, %c0_77] : memref<1x8x32xf32, #tpu.memory_space<vmem>>, vector<1x8x32xf32>
      tpu.vector_store %arg13[%c0_75, %c0_76, %c0_77], %207 {strides = array<i32>} : memref<1x8x32xf32, #tpu.memory_space<vmem>>, vector<1x8x32xf32>,
    } else {
    }
    %c0 = arith.constant 0 : index
    %c0_1 = arith.constant 0 : index
    %c0_2 = arith.constant 0 : index
    %3 = vector.load %arg13[%c0, %c0_1, %c0_2] : memref<1x8x32xf32, #tpu.memory_space<vmem>>, vector<1x8x32xf32>
    %4 = vector.shape_cast %3 : vector<1x8x32xf32> to vector<8x32xf32>
    %c0_3 = arith.constant 0 : index
    %c0_4 = arith.constant 0 : index
    %c0_5 = arith.constant 0 : index
    %5 = vector.load %arg10[%c0_3, %c0_4, %c0_5] : memref<1x6x32xf32, #tpu.memory_space<vmem>>, vector<1x6x32xf32>
    %6 = vector.shape_cast %5 : vector<1x6x32xf32> to vector<6x32xf32>
    %7 = vector.extract_strided_slice %6 {offsets = [0, 0], sizes = [1, 32], strides = [1, 1]} : vector<6x32xf32> to vector<1x32xf32>
    %8 = vector.extract_strided_slice %6 {offsets = [1, 0], sizes = [1, 32], strides = [1, 1]} : vector<6x32xf32> to vector<1x32xf32>
    %9 = vector.extract_strided_slice %6 {offsets = [2, 0], sizes = [1, 32], strides = [1, 1]} : vector<6x32xf32> to vector<1x32xf32>
    %10 = vector.extract_strided_slice %6 {offsets = [3, 0], sizes = [1, 32], strides = [1, 1]} : vector<6x32xf32> to vector<1x32xf32>
    %11 = vector.extract_strided_slice %6 {offsets = [4, 0], sizes = [1, 32], strides = [1, 1]} : vector<6x32xf32> to vector<1x32xf32>
    %12 = vector.extract_strided_slice %6 {offsets = [5, 0], sizes = [1, 32], strides = [1, 1]} : vector<6x32xf32> to vector<1x32xf32>
    %c0_6 = arith.constant 0 : index
    %c0_7 = arith.constant 0 : index
    %c0_8 = arith.constant 0 : index
    %13 = vector.load %arg3[%c0_6, %c0_7, %c0_8] : memref<1x1x8xf32, #tpu.memory_space<vmem>>, vector<1x1x8xf32>
    %cst = arith.constant 0.000000e+00 : f32
    %14 = vector.broadcast %cst : f32 to vector<1x1x8xf32>
    %15 = arith.cmpf oeq, %13, %14 : vector<1x1x8xf32>
    %cst_9 = arith.constant dense<0.000000e+00> : vector<8xf32>
    %16 = vector.multi_reduction <add>, %4, %cst_9 [1] : vector<8x32xf32> to vector<8xf32>
    %17 = vector.shape_cast %16 : vector<8xf32> to vector<8x1xf32>
    %cst_10 = arith.constant 3.200000e+01 : f32
    %18 = vector.broadcast %cst_10 : f32 to vector<8x1xf32>
    %19 = arith.divf %17, %18 : vector<8x1xf32>
    %20 = vector.broadcast %19 : vector<8x1xf32> to vector<8x32xf32>
    %21 = arith.subf %4, %20 : vector<8x32xf32>
    %22 = arith.mulf %21, %21 : vector<8x32xf32>
    %cst_11 = arith.constant dense<0.000000e+00> : vector<8xf32>
    %23 = vector.multi_reduction <add>, %22, %cst_11 [1] : vector<8x32xf32> to vector<8xf32>
    %24 = vector.shape_cast %23 : vector<8xf32> to vector<8x1xf32>
    %cst_12 = arith.constant 0.0322580636 : f32
    %25 = vector.broadcast %cst_12 : f32 to vector<8x1xf32>
    %26 = arith.mulf %24, %25 : vector<8x1xf32>
    %27 = math.sqrt %26 : vector<8x1xf32>
    %cst_13 = arith.constant 9.99999997E-7 : f32
    %28 = vector.broadcast %cst_13 : f32 to vector<8x1xf32>
    %29 = arith.addf %27, %28 : vector<8x1xf32>
    %cst_14 = arith.constant 1.000000e+00 : f32
    %30 = vector.broadcast %cst_14 : f32 to vector<8x1xf32>
    %31 = arith.divf %30, %29 : vector<8x1xf32>
    %32 = vector.broadcast %19 : vector<8x1xf32> to vector<8x32xf32>
    %33 = arith.subf %4, %32 : vector<8x32xf32>
    %34 = vector.broadcast %7 : vector<1x32xf32> to vector<8x32xf32>
    %35 = arith.mulf %34, %33 : vector<8x32xf32>
    %36 = vector.broadcast %31 : vector<8x1xf32> to vector<8x32xf32>
    %37 = arith.mulf %35, %36 : vector<8x32xf32>
    %38 = vector.broadcast %8 : vector<1x32xf32> to vector<8x32xf32>
    %39 = arith.addf %37, %38 : vector<8x32xf32>
    %40 = arith.truncf %39 : vector<8x32xf32> to vector<8x32xbf16>
    %c0_15 = arith.constant 0 : index
    %c0_16 = arith.constant 0 : index
    %c0_17 = arith.constant 0 : index
    %41 = vector.load %arg4[%c0_15, %c0_16, %c0_17] : memref<1x32x96xbf16, #tpu.memory_space<vmem>>, vector<1x32x96xbf16>
    %42 = vector.shape_cast %41 : vector<1x32x96xbf16> to vector<32x96xbf16>
    %cst_18 = arith.constant dense<0.000000e+00> : vector<8x96xf32>
    %43 = tpu.matmul %40, %42, %cst_18 {dimension_numbers = #tpu.dot_dimension_numbers<[1], [0], [0], [1], [0, 0, 1, 1], [], []>} : vector<8x32xbf16>, vector<32x96xbf16>, vector<8x96xf32> -> vector<8x96xf32>
    %c0_19 = arith.constant 0 : index
    %c0_20 = arith.constant 0 : index
    %c0_21 = arith.constant 0 : index
    %44 = vector.load %arg5[%c0_19, %c0_20, %c0_21] : memref<1x1x96xf32, #tpu.memory_space<vmem>>, vector<1x1x96xf32>
    %45 = vector.shape_cast %44 : vector<1x1x96xf32> to vector<1x96xf32>
    %46 = vector.broadcast %45 : vector<1x96xf32> to vector<8x96xf32>
    %47 = arith.addf %43, %46 : vector<8x96xf32>
    %48 = vector.shape_cast %47 : vector<8x96xf32> to vector<1x8x96xf32>
    %49 = vector.extract_strided_slice %48 {offsets = [0, 0, 0], sizes = [1, 8, 32], strides = [1, 1, 1]} : vector<1x8x96xf32> to vector<1x8x32xf32>
    %50 = vector.extract_strided_slice %48 {offsets = [0, 0, 32], sizes = [1, 8, 32], strides = [1, 1, 1]} : vector<1x8x96xf32> to vector<1x8x32xf32>
    %51 = vector.extract_strided_slice %48 {offsets = [0, 0, 64], sizes = [1, 8, 32], strides = [1, 1, 1]} : vector<1x8x96xf32> to vector<1x8x32xf32>
    %52 = vector.extract_strided_slice %49 {offsets = [0, 0, 0], sizes = [1, 8, 8], strides = [1, 1, 1]} : vector<1x8x32xf32> to vector<1x8x8xf32>
    %53 = arith.truncf %52 : vector<1x8x8xf32> to vector<1x8x8xbf16>
    %54 = vector.extract_strided_slice %50 {offsets = [0, 0, 0], sizes = [1, 8, 8], strides = [1, 1, 1]} : vector<1x8x32xf32> to vector<1x8x8xf32>
    %55 = arith.truncf %54 : vector<1x8x8xf32> to vector<1x8x8xbf16>
    %56 = vector.extract_strided_slice %51 {offsets = [0, 0, 0], sizes = [1, 8, 8], strides = [1, 1, 1]} : vector<1x8x32xf32> to vector<1x8x8xf32>
    %57 = arith.truncf %56 : vector<1x8x8xf32> to vector<1x8x8xbf16>
    "tpu.trace_start"() <{level = 10 : i32, message = "bqd,bkd->bqk"}> : () -> ()
    %cst_22 = arith.constant dense<0.000000e+00> : vector<1x8x8xf32>
    %58 = tpu.matmul %53, %55, %cst_22 {dimension_numbers = #tpu.dot_dimension_numbers<[2], [2], [1], [1], [0, 0, 0, 1, 1, 1], [0], [0]>} : vector<1x8x8xbf16>, vector<1x8x8xbf16>, vector<1x8x8xf32> -> vector<1x8x8xf32>
    "tpu.trace_stop"() : () -> ()
    %cst_23 = arith.constant 0.353553385 : f32
    %59 = vector.broadcast %cst_23 : f32 to vector<1x8x8xf32>
    %60 = arith.mulf %58, %59 : vector<1x8x8xf32>
    %cst_24 = arith.constant -1.000000e+09 : f32
    %61 = vector.shape_cast %15 : vector<1x1x8xi1> to vector<1x1x8xi1>
    %62 = vector.broadcast %61 : vector<1x1x8xi1> to vector<1x8x8xi1>
    %63 = vector.broadcast %cst_24 : f32 to vector<1x8x8xf32>
    %64 = arith.select %62, %63, %60 : vector<1x8x8xi1>, vector<1x8x8xf32>
    %cst_25 = arith.constant dense<0xFF800000> : vector<1x8xf32>
    %65 = vector.multi_reduction <maximumf>, %64, %cst_25 [2] : vector<1x8x8xf32> to vector<1x8xf32>
    %66 = vector.shape_cast %65 : vector<1x8xf32> to vector<1x8x1xf32>
    %67 = vector.broadcast %66 : vector<1x8x1xf32> to vector<1x8x8xf32>
    %68 = arith.subf %64, %67 : vector<1x8x8xf32>
    %69 = math.exp %68 : vector<1x8x8xf32>
    %cst_26 = arith.constant dense<0.000000e+00> : vector<1x8xf32>
    %70 = vector.multi_reduction <add>, %69, %cst_26 [2] : vector<1x8x8xf32> to vector<1x8xf32>
    %71 = vector.shape_cast %70 : vector<1x8xf32> to vector<1x8x1xf32>
    %72 = tpu.reciprocal %71 {approx = true} : vector<1x8x1xf32> -> vector<1x8x1xf32>
    %73 = vector.broadcast %72 : vector<1x8x1xf32> to vector<1x8x8xf32>
    %74 = arith.mulf %69, %73 : vector<1x8x8xf32>
    %75 = arith.truncf %74 : vector<1x8x8xf32> to vector<1x8x8xbf16>
    "tpu.trace_start"() <{level = 10 : i32, message = "bqk,bkd->bqd"}> : () -> ()
    %cst_27 = arith.constant dense<0.000000e+00> : vector<1x8x8xf32>
    %76 = tpu.matmul %75, %57, %cst_27 {dimension_numbers = #tpu.dot_dimension_numbers<[2], [1], [1], [2], [0, 0, 0, 1, 1, 2], [0], [0]>} : vector<1x8x8xbf16>, vector<1x8x8xbf16>, vector<1x8x8xf32> -> vector<1x8x8xf32>
    "tpu.trace_stop"() : () -> ()
    %77 = vector.extract_strided_slice %49 {offsets = [0, 0, 8], sizes = [1, 8, 8], strides = [1, 1, 1]} : vector<1x8x32xf32> to vector<1x8x8xf32>
    %78 = arith.truncf %77 : vector<1x8x8xf32> to vector<1x8x8xbf16>
    %79 = vector.extract_strided_slice %50 {offsets = [0, 0, 8], sizes = [1, 8, 8], strides = [1, 1, 1]} : vector<1x8x32xf32> to vector<1x8x8xf32>
    %80 = arith.truncf %79 : vector<1x8x8xf32> to vector<1x8x8xbf16>
    %81 = vector.extract_strided_slice %51 {offsets = [0, 0, 8], sizes = [1, 8, 8], strides = [1, 1, 1]} : vector<1x8x32xf32> to vector<1x8x8xf32>
    %82 = arith.truncf %81 : vector<1x8x8xf32> to vector<1x8x8xbf16>
    "tpu.trace_start"() <{level = 10 : i32, message = "bqd,bkd->bqk"}> : () -> ()
    %cst_28 = arith.constant dense<0.000000e+00> : vector<1x8x8xf32>
    %83 = tpu.matmul %78, %80, %cst_28 {dimension_numbers = #tpu.dot_dimension_numbers<[2], [2], [1], [1], [0, 0, 0, 1, 1, 1], [0], [0]>} : vector<1x8x8xbf16>, vector<1x8x8xbf16>, vector<1x8x8xf32> -> vector<1x8x8xf32>
    "tpu.trace_stop"() : () -> ()
    %cst_29 = arith.constant 0.353553385 : f32
    %84 = vector.broadcast %cst_29 : f32 to vector<1x8x8xf32>
    %85 = arith.mulf %83, %84 : vector<1x8x8xf32>
    %cst_30 = arith.constant -1.000000e+09 : f32
    %86 = vector.shape_cast %15 : vector<1x1x8xi1> to vector<1x1x8xi1>
    %87 = vector.broadcast %86 : vector<1x1x8xi1> to vector<1x8x8xi1>
    %88 = vector.broadcast %cst_30 : f32 to vector<1x8x8xf32>
    %89 = arith.select %87, %88, %85 : vector<1x8x8xi1>, vector<1x8x8xf32>
    %cst_31 = arith.constant dense<0xFF800000> : vector<1x8xf32>
    %90 = vector.multi_reduction <maximumf>, %89, %cst_31 [2] : vector<1x8x8xf32> to vector<1x8xf32>
    %91 = vector.shape_cast %90 : vector<1x8xf32> to vector<1x8x1xf32>
    %92 = vector.broadcast %91 : vector<1x8x1xf32> to vector<1x8x8xf32>
    %93 = arith.subf %89, %92 : vector<1x8x8xf32>
    %94 = math.exp %93 : vector<1x8x8xf32>
    %cst_32 = arith.constant dense<0.000000e+00> : vector<1x8xf32>
    %95 = vector.multi_reduction <add>, %94, %cst_32 [2] : vector<1x8x8xf32> to vector<1x8xf32>
    %96 = vector.shape_cast %95 : vector<1x8xf32> to vector<1x8x1xf32>
    %97 = tpu.reciprocal %96 {approx = true} : vector<1x8x1xf32> -> vector<1x8x1xf32>
    %98 = vector.broadcast %97 : vector<1x8x1xf32> to vector<1x8x8xf32>
    %99 = arith.mulf %94, %98 : vector<1x8x8xf32>
    %100 = arith.truncf %99 : vector<1x8x8xf32> to vector<1x8x8xbf16>
    "tpu.trace_start"() <{level = 10 : i32, message = "bqk,bkd->bqd"}> : () -> ()
    %cst_33 = arith.constant dense<0.000000e+00> : vector<1x8x8xf32>
    %101 = tpu.matmul %100, %82, %cst_33 {dimension_numbers = #tpu.dot_dimension_numbers<[2], [1], [1], [2], [0, 0, 0, 1, 1, 2], [0], [0]>} : vector<1x8x8xbf16>, vector<1x8x8xbf16>, vector<1x8x8xf32> -> vector<1x8x8xf32>
    "tpu.trace_stop"() : () -> ()
    %102 = vector.extract_strided_slice %49 {offsets = [0, 0, 16], sizes = [1, 8, 8], strides = [1, 1, 1]} : vector<1x8x32xf32> to vector<1x8x8xf32>
    %103 = arith.truncf %102 : vector<1x8x8xf32> to vector<1x8x8xbf16>
    %104 = vector.extract_strided_slice %50 {offsets = [0, 0, 16], sizes = [1, 8, 8], strides = [1, 1, 1]} : vector<1x8x32xf32> to vector<1x8x8xf32>
    %105 = arith.truncf %104 : vector<1x8x8xf32> to vector<1x8x8xbf16>
    %106 = vector.extract_strided_slice %51 {offsets = [0, 0, 16], sizes = [1, 8, 8], strides = [1, 1, 1]} : vector<1x8x32xf32> to vector<1x8x8xf32>
    %107 = arith.truncf %106 : vector<1x8x8xf32> to vector<1x8x8xbf16>
    "tpu.trace_start"() <{level = 10 : i32, message = "bqd,bkd->bqk"}> : () -> ()
    %cst_34 = arith.constant dense<0.000000e+00> : vector<1x8x8xf32>
    %108 = tpu.matmul %103, %105, %cst_34 {dimension_numbers = #tpu.dot_dimension_numbers<[2], [2], [1], [1], [0, 0, 0, 1, 1, 1], [0], [0]>} : vector<1x8x8xbf16>, vector<1x8x8xbf16>, vector<1x8x8xf32> -> vector<1x8x8xf32>
    "tpu.trace_stop"() : () -> ()
    %cst_35 = arith.constant 0.353553385 : f32
    %109 = vector.broadcast %cst_35 : f32 to vector<1x8x8xf32>
    %110 = arith.mulf %108, %109 : vector<1x8x8xf32>
    %cst_36 = arith.constant -1.000000e+09 : f32
    %111 = vector.shape_cast %15 : vector<1x1x8xi1> to vector<1x1x8xi1>
    %112 = vector.broadcast %111 : vector<1x1x8xi1> to vector<1x8x8xi1>
    %113 = vector.broadcast %cst_36 : f32 to vector<1x8x8xf32>
    %114 = arith.select %112, %113, %110 : vector<1x8x8xi1>, vector<1x8x8xf32>
    %cst_37 = arith.constant dense<0xFF800000> : vector<1x8xf32>
    %115 = vector.multi_reduction <maximumf>, %114, %cst_37 [2] : vector<1x8x8xf32> to vector<1x8xf32>
    %116 = vector.shape_cast %115 : vector<1x8xf32> to vector<1x8x1xf32>
    %117 = vector.broadcast %116 : vector<1x8x1xf32> to vector<1x8x8xf32>
    %118 = arith.subf %114, %117 : vector<1x8x8xf32>
    %119 = math.exp %118 : vector<1x8x8xf32>
    %cst_38 = arith.constant dense<0.000000e+00> : vector<1x8xf32>
    %120 = vector.multi_reduction <add>, %119, %cst_38 [2] : vector<1x8x8xf32> to vector<1x8xf32>
    %121 = vector.shape_cast %120 : vector<1x8xf32> to vector<1x8x1xf32>
    %122 = tpu.reciprocal %121 {approx = true} : vector<1x8x1xf32> -> vector<1x8x1xf32>
    %123 = vector.broadcast %122 : vector<1x8x1xf32> to vector<1x8x8xf32>
    %124 = arith.mulf %119, %123 : vector<1x8x8xf32>
    %125 = arith.truncf %124 : vector<1x8x8xf32> to vector<1x8x8xbf16>
    "tpu.trace_start"() <{level = 10 : i32, message = "bqk,bkd->bqd"}> : () -> ()
    %cst_39 = arith.constant dense<0.000000e+00> : vector<1x8x8xf32>
    %126 = tpu.matmul %125, %107, %cst_39 {dimension_numbers = #tpu.dot_dimension_numbers<[2], [1], [1], [2], [0, 0, 0, 1, 1, 2], [0], [0]>} : vector<1x8x8xbf16>, vector<1x8x8xbf16>, vector<1x8x8xf32> -> vector<1x8x8xf32>
    "tpu.trace_stop"() : () -> ()
    %127 = vector.extract_strided_slice %49 {offsets = [0, 0, 24], sizes = [1, 8, 8], strides = [1, 1, 1]} : vector<1x8x32xf32> to vector<1x8x8xf32>
    %128 = arith.truncf %127 : vector<1x8x8xf32> to vector<1x8x8xbf16>
    %129 = vector.extract_strided_slice %50 {offsets = [0, 0, 24], sizes = [1, 8, 8], strides = [1, 1, 1]} : vector<1x8x32xf32> to vector<1x8x8xf32>
    %130 = arith.truncf %129 : vector<1x8x8xf32> to vector<1x8x8xbf16>
    %131 = vector.extract_strided_slice %51 {offsets = [0, 0, 24], sizes = [1, 8, 8], strides = [1, 1, 1]} : vector<1x8x32xf32> to vector<1x8x8xf32>
    %132 = arith.truncf %131 : vector<1x8x8xf32> to vector<1x8x8xbf16>
    "tpu.trace_start"() <{level = 10 : i32, message = "bqd,bkd->bqk"}> : () -> ()
    %cst_40 = arith.constant dense<0.000000e+00> : vector<1x8x8xf32>
    %133 = tpu.matmul %128, %130, %cst_40 {dimension_numbers = #tpu.dot_dimension_numbers<[2], [2], [1], [1], [0, 0, 0, 1, 1, 1], [0], [0]>} : vector<1x8x8xbf16>, vector<1x8x8xbf16>, vector<1x8x8xf32> -> vector<1x8x8xf32>
    "tpu.trace_stop"() : () -> ()
    %cst_41 = arith.constant 0.353553385 : f32
    %134 = vector.broadcast %cst_41 : f32 to vector<1x8x8xf32>
    %135 = arith.mulf %133, %134 : vector<1x8x8xf32>
    %cst_42 = arith.constant -1.000000e+09 : f32
    %136 = vector.shape_cast %15 : vector<1x1x8xi1> to vector<1x1x8xi1>
    %137 = vector.broadcast %136 : vector<1x1x8xi1> to vector<1x8x8xi1>
    %138 = vector.broadcast %cst_42 : f32 to vector<1x8x8xf32>
    %139 = arith.select %137, %138, %135 : vector<1x8x8xi1>, vector<1x8x8xf32>
    %cst_43 = arith.constant dense<0xFF800000> : vector<1x8xf32>
    %140 = vector.multi_reduction <maximumf>, %139, %cst_43 [2] : vector<1x8x8xf32> to vector<1x8xf32>
    %141 = vector.shape_cast %140 : vector<1x8xf32> to vector<1x8x1xf32>
    %142 = vector.broadcast %141 : vector<1x8x1xf32> to vector<1x8x8xf32>
    %143 = arith.subf %139, %142 : vector<1x8x8xf32>
    %144 = math.exp %143 : vector<1x8x8xf32>
    %cst_44 = arith.constant dense<0.000000e+00> : vector<1x8xf32>
    %145 = vector.multi_reduction <add>, %144, %cst_44 [2] : vector<1x8x8xf32> to vector<1x8xf32>
    %146 = vector.shape_cast %145 : vector<1x8xf32> to vector<1x8x1xf32>
    %147 = tpu.reciprocal %146 {approx = true} : vector<1x8x1xf32> -> vector<1x8x1xf32>
    %148 = vector.broadcast %147 : vector<1x8x1xf32> to vector<1x8x8xf32>
    %149 = arith.mulf %144, %148 : vector<1x8x8xf32>
    %150 = arith.truncf %149 : vector<1x8x8xf32> to vector<1x8x8xbf16>
    "tpu.trace_start"() <{level = 10 : i32, message = "bqk,bkd->bqd"}> : () -> ()
    %cst_45 = arith.constant dense<0.000000e+00> : vector<1x8x8xf32>
    %151 = tpu.matmul %150, %132, %cst_45 {dimension_numbers = #tpu.dot_dimension_numbers<[2], [1], [1], [2], [0, 0, 0, 1, 1, 2], [0], [0]>} : vector<1x8x8xbf16>, vector<1x8x8xbf16>, vector<1x8x8xf32> -> vector<1x8x8xf32>
    "tpu.trace_stop"() : () -> ()
    %152 = tpu.concatenate %76, %101, %126, %151 in 2 : vector<1x8x8xf32>, vector<1x8x8xf32>, vector<1x8x8xf32>, vector<1x8x8xf32> -> vector<1x8x32xf32>
    %153 = arith.truncf %152 : vector<1x8x32xf32> to vector<1x8x32xbf16>
    %154 = vector.shape_cast %153 : vector<1x8x32xbf16> to vector<8x32xbf16>
    %c0_46 = arith.constant 0 : index
    %c0_47 = arith.constant 0 : index
    %c0_48 = arith.constant 0 : index
    %155 = vector.load %arg6[%c0_46, %c0_47, %c0_48] : memref<1x32x32xbf16, #tpu.memory_space<vmem>>, vector<1x32x32xbf16>
    %156 = vector.shape_cast %155 : vector<1x32x32xbf16> to vector<32x32xbf16>
    %cst_49 = arith.constant dense<0.000000e+00> : vector<8x32xf32>
    %157 = tpu.matmul %154, %156, %cst_49 {dimension_numbers = #tpu.dot_dimension_numbers<[1], [0], [0], [1], [0, 0, 1, 1], [], []>} : vector<8x32xbf16>, vector<32x32xbf16>, vector<8x32xf32> -> vector<8x32xf32>
    %158 = vector.broadcast %11 : vector<1x32xf32> to vector<8x32xf32>
    %159 = arith.addf %157, %158 : vector<8x32xf32>
    %160 = arith.addf %4, %159 : vector<8x32xf32>
    %cst_50 = arith.constant dense<0.000000e+00> : vector<8xf32>
    %161 = vector.multi_reduction <add>, %160, %cst_50 [1] : vector<8x32xf32> to vector<8xf32>
    %162 = vector.shape_cast %161 : vector<8xf32> to vector<8x1xf32>
    %cst_51 = arith.constant 3.200000e+01 : f32
    %163 = vector.broadcast %cst_51 : f32 to vector<8x1xf32>
    %164 = arith.divf %162, %163 : vector<8x1xf32>
    %165 = vector.broadcast %164 : vector<8x1xf32> to vector<8x32xf32>
    %166 = arith.subf %160, %165 : vector<8x32xf32>
    %167 = arith.mulf %166, %166 : vector<8x32xf32>
    %cst_52 = arith.constant dense<0.000000e+00> : vector<8xf32>
    %168 = vector.multi_reduction <add>, %167, %cst_52 [1] : vector<8x32xf32> to vector<8xf32>
    %169 = vector.shape_cast %168 : vector<8xf32> to vector<8x1xf32>
    %cst_53 = arith.constant 0.0322580636 : f32
    %170 = vector.broadcast %cst_53 : f32 to vector<8x1xf32>
    %171 = arith.mulf %169, %170 : vector<8x1xf32>
    %172 = math.sqrt %171 : vector<8x1xf32>
    %cst_54 = arith.constant 9.99999997E-7 : f32
    %173 = vector.broadcast %cst_54 : f32 to vector<8x1xf32>
    %174 = arith.addf %172, %173 : vector<8x1xf32>
    %cst_55 = arith.constant 1.000000e+00 : f32
    %175 = vector.broadcast %cst_55 : f32 to vector<8x1xf32>
    %176 = arith.divf %175, %174 : vector<8x1xf32>
    %177 = vector.broadcast %164 : vector<8x1xf32> to vector<8x32xf32>
    %178 = arith.subf %160, %177 : vector<8x32xf32>
    %179 = vector.broadcast %9 : vector<1x32xf32> to vector<8x32xf32>
    %180 = arith.mulf %179, %178 : vector<8x32xf32>
    %181 = vector.broadcast %176 : vector<8x1xf32> to vector<8x32xf32>
    %182 = arith.mulf %180, %181 : vector<8x32xf32>
    %183 = vector.broadcast %10 : vector<1x32xf32> to vector<8x32xf32>
    %184 = arith.addf %182, %183 : vector<8x32xf32>
    %185 = arith.truncf %184 : vector<8x32xf32> to vector<8x32xbf16>
    %c0_56 = arith.constant 0 : index
    %c0_57 = arith.constant 0 : index
    %c0_58 = arith.constant 0 : index
    %186 = vector.load %arg7[%c0_56, %c0_57, %c0_58] : memref<1x32x64xbf16, #tpu.memory_space<vmem>>, vector<1x32x64xbf16>
    %187 = vector.shape_cast %186 : vector<1x32x64xbf16> to vector<32x64xbf16>
    %cst_59 = arith.constant dense<0.000000e+00> : vector<8x64xf32>
    %188 = tpu.matmul %185, %187, %cst_59 {dimension_numbers = #tpu.dot_dimension_numbers<[1], [0], [0], [1], [0, 0, 1, 1], [], []>} : vector<8x32xbf16>, vector<32x64xbf16>, vector<8x64xf32> -> vector<8x64xf32>
    %c0_60 = arith.constant 0 : index
    %c0_61 = arith.constant 0 : index
    %c0_62 = arith.constant 0 : index
    %189 = vector.load %arg8[%c0_60, %c0_61, %c0_62] : memref<1x1x64xf32, #tpu.memory_space<vmem>>, vector<1x1x64xf32>
    %190 = vector.shape_cast %189 : vector<1x1x64xf32> to vector<1x64xf32>
    %191 = vector.broadcast %190 : vector<1x64xf32> to vector<8x64xf32>
    %192 = arith.addf %188, %191 : vector<8x64xf32>
    %cst_63 = arith.constant 0.000000e+00 : f32
    %193 = vector.broadcast %cst_63 : f32 to vector<8x64xf32>
    %194 = arith.maximumf %192, %193 : vector<8x64xf32>
    %195 = arith.truncf %194 : vector<8x64xf32> to vector<8x64xbf16>
    %c0_64 = arith.constant 0 : index
    %c0_65 = arith.constant 0 : index
    %c0_66 = arith.constant 0 : index
    %196 = vector.load %arg9[%c0_64, %c0_65, %c0_66] : memref<1x64x32xbf16, #tpu.memory_space<vmem>>, vector<1x64x32xbf16>
    %197 = vector.shape_cast %196 : vector<1x64x32xbf16> to vector<64x32xbf16>
    %cst_67 = arith.constant dense<0.000000e+00> : vector<8x32xf32>
    %198 = tpu.matmul %195, %197, %cst_67 {dimension_numbers = #tpu.dot_dimension_numbers<[1], [0], [0], [1], [0, 0, 1, 1], [], []>} : vector<8x64xbf16>, vector<64x32xbf16>, vector<8x32xf32> -> vector<8x32xf32>
    %199 = vector.broadcast %12 : vector<1x32xf32> to vector<8x32xf32>
    %200 = arith.addf %198, %199 : vector<8x32xf32>
    %201 = arith.addf %160, %200 : vector<8x32xf32>
    %202 = vector.shape_cast %201 : vector<8x32xf32> to vector<1x8x32xf32>
    %c0_68 = arith.constant 0 : index
    %c0_69 = arith.constant 0 : index
    %c0_70 = arith.constant 0 : index
    %203 = vector.load %arg13[%c0_68, %c0_69, %c0_70] : memref<1x8x32xf32, #tpu.memory_space<vmem>>, vector<1x8x32xf32>
    tpu.vector_store %arg13[%c0_68, %c0_69, %c0_70], %202 {strides = array<i32>} : memref<1x8x32xf32, #tpu.memory_space<vmem>>, vector<1x8x32xf32>,
    %c1_i32 = arith.constant 1 : i32
    %204 = arith.cmpi eq, %arg1, %c1_i32 : i32
    %205 = arith.extui %204 : i1 to i32
    %c0_i32_71 = arith.constant 0 : i32
    %206 = arith.cmpi ne, %205, %c0_i32_71 : i32
    scf.if %206 {
      %c0_72 = arith.constant 0 : index
      %c0_73 = arith.constant 0 : index
      %207 = vector.load %arg11[%c0_72, %c0_73] : memref<2x32xf32, #tpu.memory_space<vmem>>, vector<1x32xf32>
      %c1 = arith.constant 1 : index
      %c0_74 = arith.constant 0 : index
      %208 = vector.load %arg11[%c1, %c0_74] : memref<2x32xf32, #tpu.memory_space<vmem>>, vector<1x32xf32>
      %cst_75 = arith.constant dense<0.000000e+00> : vector<8xf32>
      %209 = vector.multi_reduction <add>, %201, %cst_75 [1] : vector<8x32xf32> to vector<8xf32>
      %210 = vector.shape_cast %209 : vector<8xf32> to vector<8x1xf32>
      %cst_76 = arith.constant 3.200000e+01 : f32
      %211 = vector.broadcast %cst_76 : f32 to vector<8x1xf32>
      %212 = arith.divf %210, %211 : vector<8x1xf32>
      %213 = vector.broadcast %212 : vector<8x1xf32> to vector<8x32xf32>
      %214 = arith.subf %201, %213 : vector<8x32xf32>
      %215 = arith.mulf %214, %214 : vector<8x32xf32>
      %cst_77 = arith.constant dense<0.000000e+00> : vector<8xf32>
      %216 = vector.multi_reduction <add>, %215, %cst_77 [1] : vector<8x32xf32> to vector<8xf32>
      %217 = vector.shape_cast %216 : vector<8xf32> to vector<8x1xf32>
      %cst_78 = arith.constant 0.0322580636 : f32
      %218 = vector.broadcast %cst_78 : f32 to vector<8x1xf32>
      %219 = arith.mulf %217, %218 : vector<8x1xf32>
      %220 = math.sqrt %219 : vector<8x1xf32>
      %cst_79 = arith.constant 9.99999997E-7 : f32
      %221 = vector.broadcast %cst_79 : f32 to vector<8x1xf32>
      %222 = arith.addf %220, %221 : vector<8x1xf32>
      %cst_80 = arith.constant 1.000000e+00 : f32
      %223 = vector.broadcast %cst_80 : f32 to vector<8x1xf32>
      %224 = arith.divf %223, %222 : vector<8x1xf32>
      %225 = vector.broadcast %212 : vector<8x1xf32> to vector<8x32xf32>
      %226 = arith.subf %201, %225 : vector<8x32xf32>
      %227 = vector.broadcast %207 : vector<1x32xf32> to vector<8x32xf32>
      %228 = arith.mulf %227, %226 : vector<8x32xf32>
      %229 = vector.broadcast %224 : vector<8x1xf32> to vector<8x32xf32>
      %230 = arith.mulf %228, %229 : vector<8x32xf32>
      %231 = vector.broadcast %208 : vector<1x32xf32> to vector<8x32xf32>
      %232 = arith.addf %230, %231 : vector<8x32xf32>
      %233 = vector.shape_cast %232 : vector<8x32xf32> to vector<1x8x32xf32>
      %c0_81 = arith.constant 0 : index
      %c0_82 = arith.constant 0 : index
      %c0_83 = arith.constant 0 : index
      %234 = vector.load %arg12[%c0_81, %c0_82, %c0_83] : memref<1x8x32xf32, #tpu.memory_space<vmem>>, vector<1x8x32xf32>
      tpu.vector_store %arg12[%c0_81, %c0_82, %c0_83], %233 {strides = array<i32>} : memref<1x8x32xf32, #tpu.memory_space<vmem>>, vector<1x8x32xf32>,
    } else {
    }
    return
  }
  func.func @transform_0(%arg0: i32, %arg1: i32) -> (i32, i32, i32) {
    %c0_i32 = arith.constant 0 : i32
    %c0_i32_0 = arith.constant 0 : i32
    %c0_i32_1 = arith.constant 0 : i32
    return %arg0, %c0_i32, %c0_i32_0 : i32, i32, i32
  }
  func.func @transform_1(%arg0: i32, %arg1: i32) -> (i32, i32, i32) {
    %c0_i32 = arith.constant 0 : i32
    %c0_i32_0 = arith.constant 0 : i32
    %c0_i32_1 = arith.constant 0 : i32
    return %arg0, %c0_i32, %c0_i32_0 : i32, i32, i32
  }
  func.func @transform_2(%arg0: i32, %arg1: i32) -> (i32, i32, i32) {
    %c0_i32 = arith.constant 0 : i32
    %c0_i32_0 = arith.constant 0 : i32
    %c0_i32_1 = arith.constant 0 : i32
    return %arg1, %c0_i32, %c0_i32_0 : i32, i32, i32
  }
  func.func @transform_3(%arg0: i32, %arg1: i32) -> (i32, i32, i32) {
    %c0_i32 = arith.constant 0 : i32
    %c0_i32_0 = arith.constant 0 : i32
    %c0_i32_1 = arith.constant 0 : i32
    return %arg1, %c0_i32, %c0_i32_0 : i32, i32, i32
  }
  func.func @transform_4(%arg0: i32, %arg1: i32) -> (i32, i32, i32) {
    %c0_i32 = arith.constant 0 : i32
    %c0_i32_0 = arith.constant 0 : i32
    %c0_i32_1 = arith.constant 0 : i32
    return %arg1, %c0_i32, %c0_i32_0 : i32, i32, i32
  }
  func.func @transform_5(%arg0: i32, %arg1: i32) -> (i32, i32, i32) {
    %c0_i32 = arith.constant 0 : i32
    %c0_i32_0 = arith.constant 0 : i32
    %c0_i32_1 = arith.constant 0 : i32
    return %arg1, %c0_i32, %c0_i32_0 : i32, i32, i32
  }
  func.func @transform_6(%arg0: i32, %arg1: i32) -> (i32, i32, i32) {
    %c0_i32 = arith.constant 0 : i32
    %c0_i32_0 = arith.constant 0 : i32
    %c0_i32_1 = arith.constant 0 : i32
    return %arg1, %c0_i32, %c0_i32_0 : i32, i32, i32
  }
  func.func @transform_7(%arg0: i32, %arg1: i32) -> (i32, i32, i32) {
    %c0_i32 = arith.constant 0 : i32
    %c0_i32_0 = arith.constant 0 : i32
    %c0_i32_1 = arith.constant 0 : i32
    return %arg1, %c0_i32, %c0_i32_0 : i32, i32, i32
  }
  func.func @transform_8(%arg0: i32, %arg1: i32) -> (i32, i32, i32) {
    %c0_i32 = arith.constant 0 : i32
    %c0_i32_0 = arith.constant 0 : i32
    %c0_i32_1 = arith.constant 0 : i32
    return %arg1, %c0_i32, %c0_i32_0 : i32, i32, i32
  }
  func.func @transform_9(%arg0: i32, %arg1: i32) -> (i32, i32) {
    %c0_i32 = arith.constant 0 : i32
    %c0_i32_0 = arith.constant 0 : i32
    %c0_i32_1 = arith.constant 0 : i32
    return %c0_i32, %c0_i32_0 : i32, i32
  }
  func.func @transform_10(%arg0: i32, %arg1: i32) -> (i32, i32, i32) {
    %c0_i32 = arith.constant 0 : i32
    %c0_i32_0 = arith.constant 0 : i32
    %c0_i32_1 = arith.constant 0 : i32
    return %arg0, %c0_i32, %c0_i32_0 : i32, i32, i32
  }
}

</mosaic_0001>

<bundles_post_ra>
// kernel: tpu_custom_call.1
= control target key start
LH: loop header
LB: loop body
LE: loop exit
PB: predicated region body
PF: predicated region fallthrough
CT: control target
= control target key end

     0   :  { %s2443_s0 = inlined_call_operand.hbm [shape: f32[2,8,32], index: 0, kind: input, shape index: {}]   ;;  %s2444_s1 = inlined_call_operand.vmem [shape: f32[2,1,8], index: 1, kind: input, shape index: {}]   ;;  %s2445_s2 = inlined_call_operand.vmem [shape: bf16[2,32,96], index: 2, kind: input, shape index: {}]   ;;  %s2446_s3 = inlined_call_operand.vmem [shape: f32[2,1,96], index: 3, kind: input, shape index: {}]   ;;  %s2447_s4 = inlined_call_operand.vmem [shape: bf16[2,32,32], index: 4, kind: input, shape index: {}]   ;;  %s2448_s5 = inlined_call_operand.vmem [shape: bf16[2,32,64], index: 5, kind: input, shape index: {}]   ;;  %s2449_s6 = inlined_call_operand.vmem [shape: f32[2,1,64], index: 6, kind: input, shape index: {}]   ;;  %s2450_s7 = inlined_call_operand.vmem [shape: bf16[2,64,32], index: 7, kind: input, shape index: {}]   ;;  %s2451_s8 = inlined_call_operand.vmem [shape: f32[2,6,32], index: 8, kind: input, shape index: {}]   ;;  %s2452_s9 = inlined_call_operand.vmem [shape: f32[2,32], index: 9, kind: input, shape index: {}]   ;;  %s2453_s10 = inlined_call_operand.hbm [shape: f32[2,8,32], index: 10, kind: output, shape index: {}]  }
   0x1   :  { %2467 = sst [smem:[#allocation20_spill]] %s2443_s0 }
   0x2   :  { %2468 = sst [smem:[#allocation21_spill]] %s2445_s2 }
   0x3   :  { %2469 = sst [smem:[#allocation22_spill]] %s2447_s4 }
   0x4   :  { %2470 = sst [smem:[#allocation23_spill]] %s2452_s9 }
   0x5   :  { %2471 = sst [smem:[#allocation24_spill]] %s2453_s10 }
   0x6   :  { %15 = vsyncpa [#allocation4], 0 }
   0x7   :  { %17 = vsyncpa [#allocation4 + $0x1], 0 }
   0x8   :  { %18 = vsyncpa [#allocation5], 0 }
   0x9   :  { %20 = vsyncpa [#allocation5 + $0x1], 0  ;;  %s2079_s13 = smov 0   ;;  %s2081_s14 = smov 0  }
   0xa   :  { %s2083_s15 = smov 0   ;;  %s2085_s16 = smov 0  }
   0xb   :  { %s2087_s17 = smov 0   ;;  %s2089_s18 = smov 0  }
   0xc   :  { %s2091_s19 = smov 0   ;;  %s2093_s20 = smov 0  }
   0xd LB: > { %2472 = sst [smem:[#allocation9_spill]] %s1975_s13  ;;  %s1578_s21 = sadd.s32 4294967295, %s2003_s20   ;;  %s2003_s20 = sphi %s2093_s20, %s26_s20   ;;  %s1999_s19 = sphi %s2091_s19, %s2507_s19   ;;  %s1995_s18 = sphi %s2089_s18, %s2506_s18   ;;  %s1991_s17 = sphi %s2087_s17, %s2505_s17   ;;  %s1987_s16 = sphi %s2085_s16, %s2504_s16   ;;  %s1983_s15 = sphi %s2083_s15, %s2503_s15   ;;  %s1979_s14 = sphi %s2081_s14, %s2502_s14   ;;  %s1975_s13 = sphi %s2079_s13, %s2501_s13  }
   0xe   : > { %2473 = sst [smem:[#allocation10_spill]] %s1979_s14  ;;  %s1579_s22 = sadd.s32 4294967294, %s2003_s20  }
   0xf   : > { %2474 = sst [smem:[#allocation11_spill]] %s1983_s15  ;;  %s35_s23 = sadd.s32 1, %s1995_s18 }
  0x10   : > { %2475 = sst [smem:[#allocation12_spill]] %s1995_s18  ;;  %s38_s24 = sadd.s32 1, %s1999_s19 }
  0x11   : > { %2476 = sst [smem:[#allocation13_spill]] %s1999_s19  ;;  %p36_p0 = scmp.ge.s32.totalorder %s35_s23, 2 }
  0x12   : > { %2477 = sst [smem:[#allocation14_spill]] %s2003_s20  ;;  %s45_s25 = sadd.s32 1, %s1983_s15 }
  0x13   : > { %p52_p1 = scmp.ne.s32.totalorder %s1983_s15, %s1979_s14  ;;  %p53_p2 = scmp.eq.s32.totalorder %s2003_s20, 0 }
  0x14   : > { %s2509_s23 = smov (%p36_p0, %s35_s23), 0  ;;  %s2511_s24 = smov (!%p36_p0, %s38_s24), %s1999_s19 }
  0x15   : > { %2478 = sst [smem:[#allocation15_spill]] %s2509_s23  ;;  %p2130_p3 = por %p53_p2, %p52_p1 }
  0x16   : > { %p58_p4 = scmp.ne.s32.totalorder %s1979_s14, %s1975_s13  ;;  %p40_p5 = scmp.ge.s32.totalorder %s2511_s24, 2 }
  0x17   : > { %p59_p6 = scmp.eq.s32.totalorder %s1578_s21, 0  ;;  %p311_p7 = scmp.eq.s32.totalorder %s1578_s21, 3 }
  0x18   : > { %p317_p8 = scmp.eq.s32.totalorder %s1579_s22, 3  ;;  %s2513_s24 = smov (%p40_p5, %s2511_s24), 0 }
  0x19   : > { %2480 = sst [smem:[#allocation16_spill]] %s2513_s24  ;;  %p2138_p9 = por %p59_p6, %p58_p4 }
  0x1a   : > { %p2142_p10 = por %p311_p7, %p52_p1  ;;  %s42_s29 = ssub.s32 %s1999_s19, %s2513_s24 }
  0x1b   : > { %p2148_p11 = por %p317_p8, %p58_p4  ;;  %p43_p12 = scmp.eq.s32.totalorder %s42_s29, 0 }
  0x1c   : > { %s2482_s28 = scalar_select %p2142_p10, 1, 0 }
  0x1d   : > { %s2484_s30 = scalar_select %p2148_p11, 1, 0 }
  0x1e   : > { %2483 = sst [smem:[#allocation17_spill]] %s2482_s28  ;;  %p1758_p13 = scmp.lt.s32.totalorder %s2003_s20, 4 }
  0x1f   : > { %2485 = sst [smem:[#allocation18_spill]] %s2484_s30  ;;  %s340_s11 = sand.u32 1, %s1983_s15  }
  0x20   : > { %s2155_s12 = scalar_select %p43_p12, %s1983_s15, %s45_s25  }
  0x21   : > { %s1582_s21 = sshll.u32 %s340_s11, 3  ;;  %s1583_s22 = sshll.u32 %s1999_s19, 7 }
  0x22   : > { %2486 = sst [smem:[#allocation19_spill]] %s2155_s12  ;;  %s344_s10 = scalar_lea.vmem [#allocation3], %s1582_s21 }
  0x23   : > { %s2487_s0 = sld [smem:[#allocation20_spill]]  ;;  %s351_s9 = sshll.u32 %s344_s10, 4  ;;  %s352_s9 = int_to_ptr.vmem [resolvable:$true] %s351_s9 }
  0x24   : > { %p2163_p0 = pnand %p1758_p13, %p2130_p3  ;;  %p1584_p1 = scmp.ge.s32.totalorder %s2003_s20, 1 }
  0x25   : > { %p413_p2 = scmp.lt.s32.totalorder %s2003_s20, 5  ;;  %s341_s29 = scalar_lea.sflag [#allocation4], %s340_s11 }
  0x26   : > { %p1881_p4 = pneg %p2163_p0  ;;  %s1892_s25 = scalar_lea.vmem %s352_s9, 128 }
  0x27   : > { %p1893_p5 = scmp.ne.s32.totalorder %s352_s9, %s1892_s25  ;;  %s2005_s18 = smov [#allocation3]  }
  0x28   : > { %s1897_s23 = sshll.u32 %s2005_s18, 4  ;;  %s1898_s23 = int_to_ptr.vmem [resolvable:$false] %s1897_s23 }
  0x29   : > { %s349_s13 = scalar_lea.hbm %s2487_s0, %s1583_s22  ;;  %p1895_p6 = pnand %p1893_p5, %p1881_p4 }
  0x2a   : > { %s1899_s10 = scalar_lea.vmem %s1898_s23, 256  ;;  %p1900_p8 = scmp.lt.s32.totalorder %s352_s9, %s1898_s23 }
  0x2b   : > { %p1896_p7 = pneg %p1895_p6  ;;  %p1901_p12 = scmp.lt.s32.totalorder %s1899_s10, %s1892_s25 }
  0x2d   : > { %p1902_p3 = por %p1901_p12, %p1900_p8 }
  0x2f   : > { %p1903_p13 = pnand %p1902_p3, %p1896_p7 }
  0x31   : > { %1906 = shalt.err (!%p1903_p13)
}
  0x32   : > { %1753 = dma.hbm_to_vmem [thread:$0]  (!%p2163_p0), %s349_s13, 128, %s352_s9, %s341_s29  }
  0x33   : > { %p414_p11 = pnand %p1584_p1, %p413_p2 }
  0x34   : > { %s2178_s26 = sand.u32 (!%p414_p11), 1, %s1979_s14  }
  0x35   : > { %417 = sbr.rel (%p414_p11) target bundleno = 2879 (0xb3f), region = 60  ;;  %s1585_s11 = sshll.u32 (!%p414_p11), %s2178_s26, 3 }
  0x36   : > { %s420_s21 = scalar_lea.sflag (!%p414_p11), [#allocation4], %s2178_s26  ;;  %s423_s22 = scalar_lea.vmem (!%p414_p11), [#allocation3], %s1585_s11 }
  0x3a   : > { %1966 = dma.done.wait (%p2138_p9), %s420_s21, 128  }
  0x3b   : > { %1968 = vsyncadd (%p2138_p9), %s420_s21, 4294967168  ;;  %p493_p0 = scmp.lt.s32.totalorder %s1991_s17, 1  ;;  %p496_p11 = scmp.lt.s32.totalorder %s1987_s16, 1 }
  0x3c   : > { %s2489_s2 = sld [smem:[#allocation21_spill]]  ;;  %p1596_p9 = scmp.ne.s32.totalorder %s1987_s16, 0 }
  0x3d   : > { %s2189_s9 = scalar_select %p493_p0, %s1991_s17, 1 }
  0x3e   : > { %s2192_s13 = scalar_select %p496_p11, %s1987_s16, 1 }
  0x3f   : > { %s2490_s4 = sld [smem:[#allocation22_spill]] }
  0x40   : > { %s1628_s25 = sshll.u32 %s2192_s13, 4  ;;  %s516_s18 = scalar_lea.vmem %s2449_s6, %s2192_s13 }
  0x41   : > { %s2216_s30 = scalar_lea.vmem %s2448_s5, %s1628_s25  ;;  %s1631_s23 = sshll.u32 %s2192_s13, 5 }
  0x42   : > { %s2206_s19 = scalar_lea.vmem %s2489_s2, %s1628_s25  ;;  %s1595_s10 = sshll.u32 %s2192_s13, 3 }
  0x43   : > { %s2227_s21 = scalar_lea.vmem %s2450_s7, %s1631_s23  ;;  %s2232_s12 = scalar_lea.vmem %s2451_s8, %s1595_s10 }
  0x44   : > { %530 = sbr.rel (%p1596_p9) target bundleno = 75 (0x4b), region = 68 }
  0x45   : > { %s2211_s24 = scalar_lea.vmem %s2490_s4, %s1628_s25  ;;  %s2234_s4 = scalar_lea.vmem [#allocation6], %s1585_s11 }
  0x49   : > { %v531_v0 = vld [vmem:[%s423_s22] sm:$0xff]  ;;  %vm532_vm0 = vcmask 261120  }
  0x4a   : > { %533 = vst.msk [vmem:[#allocation2] sm:$0xff] %vm532_vm0, %v531_v0 }
  0x4b PF: > { %vm538_vm1 = vcmask 261120   ;;  %v1841_v8 = vld [vmem:[%s2206_s19 + $0x8] sm:$0xff]   ;;  %v2006_v9 = vmov 0.0   ;;  %vm2007_vm2 = vmmov 0   ;;  %v1842_v10 = vld [vmem:[%s2206_s19] sm:$0xff]   ;;  %v560_v16 = vlaneseq  ;;  %s2491_s19 = scalar_lea.vmem %s2446_s3, %s2192_s13  ;;  %s2008_s20 = smov 120  }
  0x4c   : > { %1662 = vmatprep.subr.bf16.mxu0 %v2006_v9  ;;  %1666 = vmatprep.mubr.msk.bf16.mxu0 %vm2007_vm2, %v2006_v9  ;;  %v2257_v22 = vld [vmem:[%s2232_s12] sm:$0x3f]  ;;  %s2009_s28 = smov 96   ;;  %s2010_s11 = smov 88   ;;  %vm642_vm5 = vcmask 64512   ;;  %v2015_v50 = vmov 0  }
  0x4d   : > { %1663 = vmatpush3.bf16.msra.mxu0 %v1841_v8  ;;  %1670 = vmatprep.subr.bf16.mxu1 %v2006_v9  ;;  %v2253_v20 = vshrl.u32 %v560_v16, 7  ;;  %v1597_v31 = vld [vmem:[%s2491_s19] ss:$0 sm:$0xff]  ;;  %s2011_s22 = smov 80   ;;  %s2012_s27 = smov 112   ;;  %vm714_vm8 = vcmask 1043456  }
  0x4e   : > { %1664 = vmatprep.subr.bf16.mxu0 %v2006_v9  ;;  %1672 = vmatprep.mubr.msk.bf16.mxu1 %vm2007_vm2, %v2006_v9  ;;  %s2013_s25 = smov 72   ;;  %s2014_s10 = smov 104   ;;  %vm1107_vm9 = vcmask 130048   ;;  %vm1109_vm10 = vcmask 195584   ;;  %vm1312_vm13 = vcmask 523264  }
  0x4f   : > { %v562_v21 = vsub.s32 0, %v2253_v20  ;;  %v568_v24 = vsub.s32 1, %v2253_v20  ;;  %s2492_s0 = scalar_lea.vmem %s2444_s1, %s2189_s9  ;;  %s2016_s9 = smov 64  }
  0x50   : > { %v536_v49 = vld [vmem:[%s2492_s0] sm:$0x1]  ;;  %s2017_s15 = smov 56   ;;  %s2018_s12 = smov 48  }
  0x51   : > { %v2237_v1 = vld [vmem:[#allocation2] sm:$0xff]  ;;  %1665 = vmatpush3.bf16.msra.mxu0 %v1842_v10  ;;  %v563_v23 = vrot.slane %v2257_v22, %v562_v21  ;;  %v569_v26 = vrot.slane %v2257_v22, %v568_v24  ;;  %vm537_vm6 = vcmp.eq.f32.partialorder %v536_v49, 0.0  ;;  %s2019_s2 = smov 40   ;;  %s2020_s14 = smov 8  }
  0x52   : > { %v539_v2 = vsel %vm538_vm1, %v2237_v1, 0.0  ;;  %1676 = vmatprep.subr.bf16.mxu0 %v2006_v9  ;;  %v690_v51 = vsel %vm537_vm6, 1, %v2015_v50  ;;  %s2021_s19 = smov 16   ;;  %p1621_p1 = scmp.ne.s32.totalorder %s1987_s16, 1 }
  0x53   : > { %540 = vadd.xlane.f32.xlu0 %v539_v2  ;;  %v694_v52 = vrot.slane %v690_v51, %v562_v21 }
  0x55   : > { %vm695_vm7 = vcmp.eq.s32.totalorder %v694_v52, 1 }
  0xdc   : > { %v541_v3 = vpop.xlane.xlu0 %540 }
  0xdd   : > { %v543_v4 = vmul.f32 0.03125, %v541_v3 }
  0xdf   : > { %v544_v5 = vsub.f32 %v2237_v1, %v543_v4 }
  0xe1   : > { %v545_v6 = vmul.f32 %v544_v5, %v544_v5  ;;  %v564_v25 = vmul.f32 %v563_v23, %v544_v5 }
  0xe3   : > { %v546_v7 = vsel %vm538_vm1, %v545_v6, 0.0 }
  0xe4   : > { %547 = vadd.xlane.f32.xlu0 %v546_v7 }
 0x16d   : > { %v548_v11 = vpop.xlane.xlu0 %547 }
 0x16e   : > { %v549_v12 = vmul.f32 0.032258064, %v548_v11 }
 0x170   : > { %1851 = vrsqrt.f32 %v549_v12  ;;  %vm552_vm3 = vcmp.eq.f32.partialorder %v549_v12, inf  ;;  %v555_v15 = vand.u32 2147483648, %v549_v12  ;;  %vm554_vm4 = vcmp.eq.f32.partialorder %v549_v12, 0.0 }
 0x17d   : > { %v1852_v13 = vpop.eup %1851 }
 0x17e   : > { %v551_v14 = vmul.f32 %v1852_v13, %v549_v12 }
 0x180   : > { %v553_v17 = vsel %vm552_vm3, %v549_v12, %v551_v14 }
 0x181   : > { %v556_v18 = vsel %vm554_vm4, %v555_v15, %v553_v17 }
 0x182   : > { %v557_v19 = vadd.f32 1e-06, %v556_v18 }
 0x184   : > { %1853 = vrcp.f32 %v557_v19 }
 0x191   : > { %v1854_v27 = vpop.eup %1853 }
 0x192   : > { %v565_v28 = vmul.f32 %v1854_v27, %v564_v25 }
 0x194   : > { %v570_v29 = vadd.f32 %v569_v26, %v565_v28 }
 0x196   : > { %v571_v30 = vpack.c.bf16 %v570_v29, %v570_v29 }
 0x198   : > { %1667 = vmatmul.mubr.msk.bf16.vlgmr.msra.gmra.mxu0 %vm538_vm1, %v571_v30 }
 0x199   : > { %1678 = vmatprep.mubr.msk.bf16.mxu0 %vm2007_vm2, %v2006_v9 }
 0x258   : > { %v632_v32 = vpop.f32.mrf.mxu0 }
 0x259   : > { %v633_v33 = vadd.f32 %v1597_v31, %v632_v32 }
 0x25a   : > { %v1668_v34 = vpop.f32.mrf.mxu0 }
 0x25b   : > { %v2272_v35 = vpack.c.bf16 %v633_v33, %v633_v33 }
 0x25c   : > { %v635_v36 = vpop.f32.mrf.mxu0 }
 0x25d   : > { %758 = vrot.lane.b32.xlu0 %v2272_v35, %s2008_s20  ;;  %640 = vrot.lane.b32.xlu1 %v2272_v35, %s2009_s28  ;;  %s2022_s20 = smov 24  }
 0x25e   : > { %v1669_v37 = vpop.f32.mrf.mxu0 }
 0x261   : > { %760 = vrot.lane.b32.xlu1 %v2272_v35, %s2010_s11 }
 0x265   : > { %872 = vrot.lane.b32.xlu1 %v2272_v35, %s2011_s22 }
 0x269   : > { %870 = vrot.lane.b32.xlu1 %v2272_v35, %s2012_s27 }
 0x26d   : > { %984 = vrot.lane.b32.xlu1 %v2272_v35, %s2013_s25 }
 0x271   : > { %982 = vrot.lane.b32.xlu1 %v2272_v35, %s2014_s10 }
 0x2cf   : > { %v641_v38 = vpop.permute.xlu1 %640  ;;  %v759_v43 = vpop.permute.xlu0 %758 }
 0x2d0   : > { %v647_v39 = vsel %vm642_vm5, %v641_v38, 0 }
 0x2d1   : > { %1671 = vmatpush3.bf16.xpose.msra.mxu1 %v647_v39 }
 0x2d2   : > { %1682 = vmatprep.subr.bf16.mxu1 %v2006_v9 }
 0x2d3   : > { %v761_v40 = vpop.permute.xlu1 %760 }
 0x2d4   : > { %v766_v41 = vsel %vm642_vm5, %v761_v40, 0 }
 0x2d7   : > { %v873_v42 = vpop.permute.xlu1 %872 }
 0x2d8   : > { %1673 = vmatmul.mubr.msk.bf16.vlgmr.msra.gmra.mxu1 %vm642_vm5, %v2272_v35  ;;  %v878_v45 = vsel %vm642_vm5, %v873_v42, 0 }
 0x2d9   : > { %1683 = vmatpush3.bf16.xpose.msra.mxu1 %v766_v41  ;;  %1684 = vmatprep.mubr.msk.bf16.mxu1 %vm2007_vm2, %v2006_v9 }
 0x2da   : > { %1694 = vmatprep.subr.bf16.mxu1 %v2006_v9 }
 0x2db   : > { %v871_v44 = vpop.permute.xlu1 %870 }
 0x2df   : > { %v985_v46 = vpop.permute.xlu1 %984 }
 0x2e0   : > { %1685 = vmatmul.mubr.msk.bf16.vlgmr.msra.gmra.mxu1 %vm642_vm5, %v759_v43  ;;  %v990_v47 = vsel %vm642_vm5, %v985_v46, 0 }
 0x2e1   : > { %1695 = vmatpush3.bf16.xpose.msra.mxu1 %v878_v45  ;;  %1696 = vmatprep.mubr.msk.bf16.mxu1 %vm2007_vm2, %v2006_v9 }
 0x2e2   : > { %1706 = vmatprep.subr.bf16.mxu1 %v2006_v9 }
 0x2e3   : > { %v983_v48 = vpop.permute.xlu1 %982 }
 0x2e8   : > { %1697 = vmatmul.mubr.msk.bf16.vlgmr.msra.gmra.mxu1 %vm642_vm5, %v871_v44 }
 0x2e9   : > { %1707 = vmatpush3.bf16.xpose.msra.mxu1 %v990_v47  ;;  %1708 = vmatprep.mubr.msk.bf16.mxu1 %vm2007_vm2, %v2006_v9 }
 0x2ea   : > { %1718 = vmatprep.subr.bf16.mxu1 %v2006_v9 }
 0x2f0   : > { %1709 = vmatmul.mubr.msk.bf16.vlgmr.msra.gmra.mxu1 %vm642_vm5, %v983_v48 }
 0x2f1   : > { %1722 = vmatprep.mubr.msk.bf16.mxu1 %vm2007_vm2, %v2006_v9 }
 0x398   : > { %v683_v53 = vpop.f32.mrf.mxu1 }
 0x399   : > { %v689_v54 = vmul.f32 0.35355338, %v683_v53 }
 0x39a   : > { %v1674_v55 = vpop.f32.mrf.mxu1 }
 0x39b   : > { %v696_v56 = vsel %vm695_vm7, -1e+09, %v689_v54 }
 0x39c   : > { %v686_v57 = vpop.f32.mrf.mxu1  ;;  %v697_v58 = vsel %vm642_vm5, %v696_v56, -inf }
 0x39d   : > { %698 = vmax.xlane.f32.xlu1 %v697_v58 }
 0x39e   : > { %v1675_v59 = vpop.f32.mrf.mxu1 }
 0x3a0   : > { %v802_v60 = vpop.f32.mrf.mxu1 }
 0x3a1   : > { %v808_v61 = vmul.f32 0.35355338, %v802_v60 }
 0x3a2   : > { %v1686_v62 = vpop.f32.mrf.mxu1 }
 0x3a3   : > { %v809_v63 = vsel %vm695_vm7, -1e+09, %v808_v61 }
 0x3a4   : > { %v805_v0 = vpop.f32.mrf.mxu1  ;;  %v810_v2 = vsel %vm642_vm5, %v809_v63, -inf }
 0x3a5   : > { %811 = vmax.xlane.f32.xlu0 %v810_v2 }
 0x3a6   : > { %v1687_v3 = vpop.f32.mrf.mxu1 }
 0x3a8   : > { %v914_v4 = vpop.f32.mrf.mxu1 }
 0x3a9   : > { %v920_v5 = vmul.f32 0.35355338, %v914_v4 }
 0x3aa   : > { %v1698_v6 = vpop.f32.mrf.mxu1 }
 0x3ab   : > { %v921_v7 = vsel %vm695_vm7, -1e+09, %v920_v5 }
 0x3ac   : > { %v917_v8 = vpop.f32.mrf.mxu1  ;;  %v922_v10 = vsel %vm642_vm5, %v921_v7, -inf }
 0x3ad   : > { %923 = vmax.xlane.f32.xlu1 %v922_v10 }
 0x3ae   : > { %v1699_v11 = vpop.f32.mrf.mxu1 }
 0x3af   : > { %v1843_v11 = vld [vmem:[%s2211_s24 + $0x8] sm:$0xff]  }
 0x3b0   : > { %v1026_v12 = vpop.f32.mrf.mxu1  ;;  %1719 = vmatpush3.bf16.msra.mxu1 %v1843_v11 }
 0x3b1   : > { %v1032_v13 = vmul.f32 0.35355338, %v1026_v12  ;;  %v1844_v12 = vld [vmem:[%s2211_s24] sm:$0xff]   ;;  %1720 = vmatprep.subr.bf16.mxu1 %v2006_v9 }
 0x3b2   : > { %v1710_v14 = vpop.f32.mrf.mxu1 }
 0x3b3   : > { %v1033_v15 = vsel %vm695_vm7, -1e+09, %v1032_v13 }
 0x3b4   : > { %v1029_v16 = vpop.f32.mrf.mxu1  ;;  %v1034_v17 = vsel %vm642_vm5, %v1033_v15, -inf  ;;  %1721 = vmatpush3.bf16.msra.mxu1 %v1844_v12  ;;  %v1286_v12 = vsub.s32 5, %v2253_v20 }
 0x3b5   : > { %1035 = vmax.xlane.f32.xlu0 %v1034_v17  ;;  %1734 = vmatprep.subr.bf16.mxu1 %v2006_v9 }
 0x3b6   : > { %v1711_v18 = vpop.f32.mrf.mxu1 }
 0x426   : > { %v699_v19 = vpop.xlane.xlu1 %698 }
 0x427   : > { %v700_v21 = vsub.f32 %v696_v56, %v699_v19 }
 0x429   : > { %v701_v23 = vmul.f32 1.442695, %v700_v21 }
 0x42b   : > { %1855 = vpow2.f32 %v701_v23 }
 0x42e   : > { %v812_v24 = vpop.xlane.xlu0 %811 }
 0x42f   : > { %v813_v25 = vsub.f32 %v809_v63, %v812_v24 }
 0x431   : > { %v814_v26 = vmul.f32 1.442695, %v813_v25 }
 0x433   : > { %1857 = vpow2.f32 %v814_v26 }
 0x436   : > { %v924_v37 = vpop.xlane.xlu1 %923 }
 0x437   : > { %v925_v38 = vsub.f32 %v921_v7, %v924_v37 }
 0x438   : > { %v1856_v27 = vpop.eup %1855 }
 0x439   : > { %v703_v28 = vsel %vm642_vm5, %v1856_v27, 0.0  ;;  %v926_v39 = vmul.f32 1.442695, %v925_v38 }
 0x43a   : > { %704 = vadd.xlane.f32.xlu1 %v703_v28 }
 0x43e   : > { %v1036_v29 = vpop.xlane.xlu0 %1035 }
 0x43f   : > { %v1037_v30 = vsub.f32 %v1033_v15, %v1036_v29 }
 0x440   : > { %v1858_v31 = vpop.eup %1857 }
 0x441   : > { %v1038_v32 = vmul.f32 1.442695, %v1037_v30  ;;  %v816_v33 = vsel %vm642_vm5, %v1858_v31, 0.0  ;;  %v1118_v30 = vsub.s32 4, %v2253_v20 }
 0x442   : > { %817 = vadd.xlane.f32.xlu0 %v816_v33 }
 0x443   : > { %1859 = vpow2.f32 %v1038_v32 }
 0x444   : > { %1861 = vpow2.f32 %v926_v39 }
 0x44b   : > { %709 = vrot.lane.b32.xlu1 %v2272_v35, %s2016_s9 }
 0x450   : > { %v1860_v34 = vpop.eup %1859 }
 0x451   : > { %v1040_v36 = vsel %vm642_vm5, %v1860_v34, 0.0  ;;  %v1862_v40 = vpop.eup %1861 }
 0x452   : > { %1041 = vadd.xlane.f32.xlu0 %v1040_v36  ;;  %v928_v41 = vsel %vm642_vm5, %v1862_v40, 0.0 }
 0x468   : > { %822 = vrot.lane.b32.xlu0 %v2272_v35, %s2017_s15 }
 0x46f   : > { %929 = vadd.xlane.f32.xlu1 %v928_v41 }
 0x480   : > { %934 = vrot.lane.b32.xlu1 %v2272_v35, %s2018_s12 }
 0x484   : > { %1046 = vrot.lane.b32.xlu1 %v2272_v35, %s2019_s2 }
 0x4c3   : > { %v705_v42 = vpop.xlane.xlu1 %704 }
 0x4c4   : > { %1863 = vrcp.f32 %v705_v42 }
 0x4c7   : > { %v710_v43 = vpop.permute.xlu1 %709 }
 0x4c8   : > { %v716_v44 = vsel %vm714_vm8, %v710_v43, 0 }
 0x4c9   : > { %1677 = vmatpush3.bf16.msra.mxu0 %v716_v44 }
 0x4ca   : > { %1688 = vmatprep.subr.bf16.mxu0 %v2006_v9 }
 0x4cb   : > { %v818_v45 = vpop.xlane.xlu0 %817 }
 0x4cc   : > { %1865 = vrcp.f32 %v818_v45  ;;  %v1845_v45 = vld [vmem:[%s2216_s30 + $0x8] sm:$0xff]  }
 0x4d1   : > { %v1864_v46 = vpop.eup %1863 }
 0x4d2   : > { %v707_v47 = vmul.f32 %v1864_v46, %v1856_v27  ;;  %v1847_v46 = vld [vmem:[%s2227_s21 + $0x18] sm:$0xff]  }
 0x4d4   : > { %v708_v48 = vpack.c.bf16 %v707_v47, %v707_v47  ;;  %v1848_v47 = vld [vmem:[%s2227_s21 + $0x10] sm:$0xff]  }
 0x4d6   : > { %1679 = vmatmul.mubr.msk.bf16.vlgmr.msra.gmra.mxu0 %vm642_vm5, %v708_v48 }
 0x4d7   : > { %1690 = vmatprep.mubr.msk.bf16.mxu0 %vm2007_vm2, %v2006_v9 }
 0x4d9   : > { %v1866_v35 = vpop.eup %1865 }
 0x4da   : > { %v820_v50 = vmul.f32 %v1866_v35, %v1858_v31  ;;  %v1119_v31 = vrot.slane %v2257_v22, %v1118_v30 }
 0x4db   : > { %v1042_v49 = vpop.xlane.xlu0 %1041 }
 0x4dc   : > { %v821_v53 = vpack.c.bf16 %v820_v50, %v820_v50 }
 0x4df   : > { %v823_v51 = vpop.permute.xlu0 %822 }
 0x4e0   : > { %v828_v52 = vsel %vm714_vm8, %v823_v51, 0 }
 0x4e1   : > { %1689 = vmatpush3.bf16.msra.mxu0 %v828_v52 }
 0x4e2   : > { %1700 = vmatprep.subr.bf16.mxu0 %v2006_v9 }
 0x4e4   : > { %1691 = vmatmul.mubr.msk.bf16.vlgmr.msra.gmra.mxu0 %vm642_vm5, %v821_v53 }
 0x4e5   : > { %1702 = vmatprep.mubr.msk.bf16.mxu0 %vm2007_vm2, %v2006_v9 }
 0x4f8   : > { %v930_v54 = vpop.xlane.xlu1 %929 }
 0x4f9   : > { %1867 = vrcp.f32 %v930_v54 }
 0x4fa   : > { %1869 = vrcp.f32 %v1042_v49 }
 0x4fc   : > { %v935_v55 = vpop.permute.xlu1 %934 }
 0x4fd   : > { %v940_v56 = vsel %vm714_vm8, %v935_v55, 0  ;;  %v1198_v55 = vsub.s32 2, %v2253_v20 }
 0x4fe   : > { %1701 = vmatpush3.bf16.msra.mxu0 %v940_v56 }
 0x4ff   : > { %1712 = vmatprep.subr.bf16.mxu0 %v2006_v9  ;;  %v1199_v56 = vrot.slane %v2257_v22, %v1198_v55 }
 0x500   : > { %v1047_v59 = vpop.permute.xlu1 %1046 }
 0x501   : > { %v1052_v62 = vsel %vm714_vm8, %v1047_v59, 0 }
 0x506   : > { %v1868_v57 = vpop.eup %1867 }
 0x507   : > { %v932_v58 = vmul.f32 %v1868_v57, %v1862_v40  ;;  %v1870_v61 = vpop.eup %1869  ;;  %v1204_v57 = vsub.s32 3, %v2253_v20 }
 0x508   : > { %v1044_v63 = vmul.f32 %v1870_v61, %v1860_v34 }
 0x509   : > { %v933_v60 = vpack.c.bf16 %v932_v58, %v932_v58  ;;  %v1205_v59 = vrot.slane %v2257_v22, %v1204_v57 }
 0x50a   : > { %v1045_v0 = vpack.c.bf16 %v1044_v63, %v1044_v63 }
 0x50b   : > { %1703 = vmatmul.mubr.msk.bf16.vlgmr.msra.gmra.mxu0 %vm642_vm5, %v933_v60 }
 0x50c   : > { %1713 = vmatpush3.bf16.msra.mxu0 %v1052_v62  ;;  %1714 = vmatprep.mubr.msk.bf16.mxu0 %vm2007_vm2, %v2006_v9 }
 0x50d   : > { %1726 = vmatprep.subr.bf16.mxu0 %v2006_v9 }
 0x513   : > { %1715 = vmatmul.mubr.msk.bf16.vlgmr.msra.gmra.mxu0 %vm642_vm5, %v1045_v0  ;;  %v1849_v0 = vld [vmem:[%s2227_s21 + $0x8] sm:$0xff]  }
 0x514   : > { %1730 = vmatprep.mubr.msk.bf16.mxu0 %vm2007_vm2, %v2006_v9  ;;  %1727 = vmatpush3.bf16.msra.mxu0 %v1845_v45 }
 0x515   : > { %1728 = vmatprep.subr.bf16.mxu0 %v2006_v9 }
 0x596   : > { %v752_v2 = vpop.f32.mrf.mxu0 }
 0x598   : > { %v1680_v3 = vpop.f32.mrf.mxu0 }
 0x599   : > { %v1612_v3 = vld [vmem:[%s516_s18] ss:$0 sm:$0xff]  ;;  %s2493_s18 = sld [smem:[#allocation23_spill]] (!%p1621_p1) }
 0x59a   : > { %v755_v4 = vpop.f32.mrf.mxu0 }
 0x59c   : > { %v1681_v5 = vpop.f32.mrf.mxu0 }
 0x5a4   : > { %v864_v6 = vpop.f32.mrf.mxu0 }
 0x5a5   : > { %1095 = vrot.lane.b32.xlu0 %v864_v6, %s2020_s14 }
 0x5a6   : > { %v1692_v7 = vpop.f32.mrf.mxu0 }
 0x5a8   : > { %v867_v8 = vpop.f32.mrf.mxu0 }
 0x5aa   : > { %v1693_v10 = vpop.f32.mrf.mxu0 }
 0x5cb   : > { %v976_v13 = vpop.f32.mrf.mxu0 }
 0x5cc   : > { %1099 = vrot.lane.b32.xlu1 %v976_v13, %s2021_s19 }
 0x5cd   : > { %v1704_v14 = vpop.f32.mrf.mxu0 }
 0x5cf   : > { %v979_v15 = vpop.f32.mrf.mxu0 }
 0x5d1   : > { %v1705_v16 = vpop.f32.mrf.mxu0 }
 0x5d3   : > { %v1088_v17 = vpop.f32.mrf.mxu0 }
 0x5d4   : > { %1103 = vrot.lane.b32.xlu0 %v1088_v17, %s2022_s20 }
 0x5d5   : > { %v1716_v18 = vpop.f32.mrf.mxu0 }
 0x5d7   : > { %v1091_v19 = vpop.f32.mrf.mxu0 }
 0x5d9   : > { %v1717_v21 = vpop.f32.mrf.mxu0 }
 0x617   : > { %v1096_v23 = vpop.permute.xlu0 %1095 }
 0x618   : > { %v1106_v25 = vsel %vm642_vm5, %v752_v2, %v1096_v23  ;;  %v1850_v2 = vld [vmem:[%s2227_s21] sm:$0xff]   ;;  %s2494_s21 = smov (!%p1621_p1), %s2493_s18 }
 0x63e   : > { %v1100_v24 = vpop.permute.xlu1 %1099 }
 0x63f   : > { %v1108_v26 = vsel %vm1107_vm9, %v1106_v25, %v1100_v24 }
 0x646   : > { %v1104_v27 = vpop.permute.xlu0 %1103 }
 0x647   : > { %v1110_v28 = vsel %vm1109_vm10, %v1108_v26, %v1104_v27 }
 0x648   : > { %v1111_v29 = vpack.c.bf16 %v1110_v28, %v1110_v28 }
 0x64a   : > { %1723 = vmatmul.mubr.msk.bf16.vlgmr.msra.gmra.mxu1 %vm538_vm1, %v1111_v29 }
 0x64b   : > { %1742 = vmatprep.mubr.msk.bf16.mxu1 %vm2007_vm2, %v2006_v9  ;;  %1735 = vmatpush3.bf16.msra.mxu1 %v1847_v46 }
 0x64c   : > { %1736 = vmatprep.subr.bf16.mxu1 %v2006_v9 }
 0x64f   : > { %1737 = vmatpush3.bf16.msra.mxu1 %v1848_v47 }
 0x650   : > { %1738 = vmatprep.subr.bf16.mxu1 %v2006_v9 }
 0x653   : > { %1739 = vmatpush3.bf16.msra.mxu1 %v1849_v0 }
 0x654   : > { %1740 = vmatprep.subr.bf16.mxu1 %v2006_v9  ;;  %v1287_v9 = vrot.slane %v2257_v22, %v1286_v12 }
 0x657   : > { %1741 = vmatpush3.bf16.msra.mxu1 %v1850_v2 }
 0x70a   : > { %v1169_v32 = vpop.f32.mrf.mxu1 }
 0x70b   : > { %v1170_v33 = vadd.f32 %v1169_v32, %v1119_v31 }
 0x70c   : > { %v1724_v34 = vpop.f32.mrf.mxu1 }
 0x70d   : > { %v2356_v36 = vadd.f32 %v1170_v33, %v2237_v1  ;;  %v1846_v1 = vld [vmem:[%s2216_s30] sm:$0xff]  }
 0x70e   : > { %v1172_v37 = vpop.f32.mrf.mxu1  ;;  %1729 = vmatpush3.bf16.msra.mxu0 %v1846_v1 }
 0x70f   : > { %v1176_v38 = vsel %vm538_vm1, %v2356_v36, 0.0 }
 0x710   : > { %1177 = vadd.xlane.f32.xlu1 %v1176_v38  ;;  %v1725_v39 = vpop.f32.mrf.mxu1 }
 0x799   : > { %v1178_v40 = vpop.xlane.xlu1 %1177 }
 0x79a   : > { %v1179_v41 = vmul.f32 0.03125, %v1178_v40 }
 0x79c   : > { %v1180_v42 = vsub.f32 %v2356_v36, %v1179_v41 }
 0x79e   : > { %v1181_v43 = vmul.f32 %v1180_v42, %v1180_v42  ;;  %v1200_v58 = vmul.f32 %v1199_v56, %v1180_v42 }
 0x7a0   : > { %v1182_v44 = vsel %vm538_vm1, %v1181_v43, 0.0 }
 0x7a1   : > { %1183 = vadd.xlane.f32.xlu0 %v1182_v44 }
 0x82a   : > { %v1184_v48 = vpop.xlane.xlu0 %1183 }
 0x82b   : > { %v1185_v35 = vmul.f32 0.032258064, %v1184_v48 }
 0x82d   : > { %1871 = vrsqrt.f32 %v1185_v35  ;;  %vm1188_vm11 = vcmp.eq.f32.partialorder %v1185_v35, inf  ;;  %v1191_v51 = vand.u32 2147483648, %v1185_v35  ;;  %vm1190_vm12 = vcmp.eq.f32.partialorder %v1185_v35, 0.0 }
 0x83a   : > { %v1872_v49 = vpop.eup %1871 }
 0x83b   : > { %v1187_v50 = vmul.f32 %v1872_v49, %v1185_v35 }
 0x83d   : > { %v1189_v52 = vsel %vm1188_vm11, %v1185_v35, %v1187_v50 }
 0x83e   : > { %v1192_v53 = vsel %vm1190_vm12, %v1191_v51, %v1189_v52 }
 0x83f   : > { %v1193_v54 = vadd.f32 1e-06, %v1192_v53 }
 0x841   : > { %1873 = vrcp.f32 %v1193_v54 }
 0x84e   : > { %v1874_v60 = vpop.eup %1873 }
 0x84f   : > { %v1201_v61 = vmul.f32 %v1874_v60, %v1200_v58 }
 0x851   : > { %v1206_v62 = vadd.f32 %v1205_v59, %v1201_v61 }
 0x853   : > { %v1207_v63 = vpack.c.bf16 %v1206_v62, %v1206_v62 }
 0x855   : > { %1731 = vmatmul.mubr.msk.bf16.vlgmr.msra.gmra.mxu0 %vm538_vm1, %v1207_v63 }
 0x915   : > { %v1268_v4 = vpop.f32.mrf.mxu0 }
 0x916   : > { %v1269_v5 = vadd.f32 %v1612_v3, %v1268_v4 }
 0x917   : > { %v1732_v6 = vpop.f32.mrf.mxu0 }
 0x918   : > { %v1274_v7 = vmax.f32 %v1269_v5, 0.0 }
 0x919   : > { %v1271_v8 = vpop.f32.mrf.mxu0 }
 0x91a   : > { %v1275_v10 = vpack.c.bf16 %v1274_v7, %v1274_v7 }
 0x91b   : > { %v1733_v11 = vpop.f32.mrf.mxu0 }
 0x91c   : > { %1743 = vmatmul.mubr.msk.bf16.vlgmr.msra.gmra.mxu1 %vm1312_vm13, %v1275_v10 }
 0x9dc   : > { %v1350_v13 = vpop.f32.mrf.mxu1 }
 0x9dd   : > { %v1351_v14 = vadd.f32 %v1350_v13, %v1287_v9 }
 0x9de   : > { %v1744_v15 = vpop.f32.mrf.mxu1  ;;  %1361 = sbr.rel (%p1621_p1) target bundleno = 2856 (0xb28), region = 72 }
 0x9df   : > { %v1356_v16 = vadd.f32 %v1351_v14, %v2356_v36 }
 0x9e0   : > { %v1353_v17 = vpop.f32.mrf.mxu1 }
 0x9e1   : > { %1357 = vst.msk [vmem:[#allocation2] sm:$0xff] %vm538_vm1, %v1356_v16 }
 0x9e2   : > { %v1745_v18 = vpop.f32.mrf.mxu1 }
 0x9e3   : > { %v1364_v19 = vsel %vm538_vm1, %v1356_v16, 0.0  ;;  %v1622_v33 = vld [vmem:[%s2493_s18] ss:$0 sm:$0xff]  ;;  %v1623_v37 = vld [vmem:[%s2494_s21 + $0x1] ss:$0 sm:$0xff] }
 0x9e4   : > { %1365 = vadd.xlane.f32.xlu0 %v1364_v19 }
 0xa6d   : > { %v1366_v21 = vpop.xlane.xlu0 %1365 }
 0xa6e   : > { %v1367_v23 = vmul.f32 0.03125, %v1366_v21 }
 0xa70   : > { %v1368_v20 = vsub.f32 %v1356_v16, %v1367_v23 }
 0xa72   : > { %v1369_v24 = vmul.f32 %v1368_v20, %v1368_v20  ;;  %v1388_v34 = vmul.f32 %v1622_v33, %v1368_v20 }
 0xa74   : > { %v1370_v22 = vsel %vm538_vm1, %v1369_v24, 0.0 }
 0xa75   : > { %1371 = vadd.xlane.f32.xlu0 %v1370_v22 }
 0xafe   : > { %v1372_v25 = vpop.xlane.xlu0 %1371 }
 0xaff   : > { %v1373_v26 = vmul.f32 0.032258064, %v1372_v25 }
 0xb01   : > { %1875 = vrsqrt.f32 %v1373_v26  ;;  %vm1376_vm14 = vcmp.eq.f32.partialorder %v1373_v26, inf  ;;  %v1379_v29 = vand.u32 2147483648, %v1373_v26  ;;  %vm1378_vm15 = vcmp.eq.f32.partialorder %v1373_v26, 0.0 }
 0xb0e   : > { %v1876_v27 = vpop.eup %1875 }
 0xb0f   : > { %v1375_v28 = vmul.f32 %v1876_v27, %v1373_v26 }
 0xb11   : > { %v1377_v30 = vsel %vm1376_vm14, %v1373_v26, %v1375_v28 }
 0xb12   : > { %v1380_v31 = vsel %vm1378_vm15, %v1379_v29, %v1377_v30 }
 0xb13   : > { %v1381_v32 = vadd.f32 1e-06, %v1380_v31 }
 0xb15   : > { %1877 = vrcp.f32 %v1381_v32 }
 0xb22   : > { %v1878_v36 = vpop.eup %1877 }
 0xb23   : > { %v1389_v38 = vmul.f32 %v1878_v36, %v1388_v34 }
 0xb25   : > { %v1394_v39 = vadd.f32 %v1623_v37, %v1389_v38 }
 0xb27   : > { %1395 = vst.msk [vmem:[%s2234_s4] sm:$0xff] %vm538_vm1, %v1394_v39 }
 0xb28 PF: > { %s1625_s27 = sshll.u32 %s1991_s17, 7  ;;  %s2496_s29 = sld [smem:[#allocation24_spill]] }
 0xb29   : > { %s1410_s0 = sshll.u32 %s2234_s4, 4  ;;  %s1397_s9 = scalar_lea.sflag [#allocation5], %s2178_s26  ;;  %s1411_s0 = int_to_ptr.vmem [resolvable:$true] %s1410_s0 }
 0xb2a   : > { %s1907_s15 = scalar_lea.vmem %s1411_s0, 128  ;;  %s2023_s12 = smov [#allocation6]  }
 0xb2b   : > { %p1908_p2 = scmp.ne.s32.totalorder %s1411_s0, %s1907_s15  ;;  %s1911_s2 = sshll.u32 %s2023_s12, 4  ;;  %s1912_s2 = int_to_ptr.vmem [resolvable:$false] %s1911_s2 }
 0xb2c   : > { %s1913_s14 = scalar_lea.vmem %s1912_s2, 256  ;;  %p1914_p6 = scmp.lt.s32.totalorder %s1411_s0, %s1912_s2 }
 0xb2d   : > { %p1909_p4 = pnand %p1908_p2, %p2142_p10  ;;  %p1915_p7 = scmp.lt.s32.totalorder %s1913_s14, %s1907_s15 }
 0xb2e   : > { %s1408_s23 = scalar_lea.hbm %s2496_s29, %s1625_s27 }
 0xb2f   : > { %p1910_p5 = pneg %p1909_p4  ;;  %p1916_p8 = por %p1915_p7, %p1914_p6 }
 0xb31   : > { %p1917_p12 = pnand %p1916_p8, %p1910_p5 }
 0xb33   : > { %1920 = shalt.err (!%p1917_p12)
}
 0xb34   : > { %s1921_s17 = scalar_lea.hbm %s1408_s23, 128  ;;  %s1925_s19 = scalar_lea.hbm %s2496_s29, 256 }
 0xb35   : > { %p1922_p3 = scmp.ne.s32.totalorder %s1408_s23, %s1921_s17  ;;  %p1926_p11 = scmp.lt.s32.totalorder %s1408_s23, %s2496_s29 }
 0xb36   : > { %p1927_p9 = scmp.lt.s32.totalorder %s1925_s19, %s1921_s17 }
 0xb37   : > { %p1923_p13 = pnand %p1922_p3, %p2142_p10 }
 0xb38   : > { %p1928_p1 = por %p1927_p9, %p1926_p11 }
 0xb39   : > { %p1924_p0 = pneg %p1923_p13 }
 0xb3b   : > { %p1929_p2 = pnand %p1928_p1, %p1924_p0 }
 0xb3d   : > { %1932 = shalt.err (!%p1929_p2)
}
 0xb3e   : > { %1748 = dma.vmem_to_hbm [thread:$0]  (%p2142_p10), %s1411_s0, 128, %s1408_s23, %s1397_s9  }
 0xb3f PF: > { %s2497_s24 = sld [smem:[#allocation14_spill]] }
 0xb40   : > { %s2498_s16 = sld [smem:[#allocation9_spill]] }
 0xb41   : > { %s2499_s13 = sld [smem:[#allocation18_spill]] }
 0xb45   : > { %p1759_p4 = scmp.ge.s32.totalorder %s2497_s24, 2 }
 0xb46   : > { %s1422_s18 = sand.u32 1, %s2498_s16  }
 0xb47   : > { %p2500_p5 = scmp.ne.s32.totalorder %s2499_s13, 0  ;;  %s1423_s28 = scalar_lea.sflag [#allocation5], %s1422_s18 }
 0xb49   : > { %p1755_p6 = pnand %p1759_p4, %p2500_p5 }
 0xb4b   : > { %p1756_p7 = pneg %p1755_p6 }
 0xb4d   : > { %1970 = dma.done.wait (%p1756_p7), %s1423_s28, 128  }
 0xb4e   : > { %1972 = vsyncadd (%p1756_p7), %s1423_s28, 4294967168  ;;  %s26_s20 = sadd.s32 1, %s2497_s24   ;;  %s2501_s13 = sld [smem:[#allocation10_spill]] }
 0xb4f   : > { %p23_p8 = scmp.ge.s32.totalorder %s26_s20, 6   ;;  %s2502_s14 = sld [smem:[#allocation11_spill]] }
 0xb50   : > { %s2503_s15 = sld [smem:[#allocation19_spill]] }
 0xb51   : > { %s2504_s16 = sld [smem:[#allocation12_spill]]  ;;  %25 = sbr.rel (!%p23_p8) target bundleno = 13 (0xd), region = 137 }
 0xb52   : > { %s2505_s17 = sld [smem:[#allocation13_spill]] }
 0xb53   : > { %s2506_s18 = sld [smem:[#allocation15_spill]] }
 0xb54   : > { %s2507_s19 = sld [smem:[#allocation16_spill]] }
 0xb56   :  { %1428 = vsyncpa [#allocation4], 1 }
 0xb57   :  { %1430 = vsyncpa [#allocation4 + $0x1], 1 }
 0xb58   :  { %1431 = vsyncpa [#allocation5], 1 }
 0xb59   :  { %1433 = vsyncpa [#allocation5 + $0x1], 1 }

</bundles_post_ra>
